<compile_context>
chip_gen: v5e
topology: v5e:2x2
jax: 0.10.0
libtpu: 0.0.40
codegen_flags: <defaults>
</compile_context>

<pallas_src>
import jax
import jax.numpy as jnp
import numpy as np
from jax import lax
from jax.experimental import pallas as pl
from jax.experimental.pallas import tpu as pltpu


# ----------------------------------------------------------------------------
# Kernel 1: semantic-level grouped softmax -> weight map w (D, HW)
#   - softmax preds over disparity
#   - per-pixel argmax disparity (on raw preds: softmax is monotone, so this
#     matches torch.argmax on the softmaxed preds and is insensitive to the
#     approx reciprocal below)
#   - softmax of the argmax-class scores over all pixels of that class
#   - key_feats = feats_sl + x  ==  x * (1 + w), applied later in kernel 2
# ----------------------------------------------------------------------------
def _semantic_weight_kernel(preds_ref, w_ref):
    praw = preds_ref[0].astype(jnp.float32)                      # (D, HW)
    D = praw.shape[0]

    # softmax over disparity axis (EUP reciprocal)
    p = praw - jnp.max(praw, axis=0, keepdims=True)
    e = jnp.exp(p)
    psoft = e * pl.reciprocal(jnp.sum(e, axis=0, keepdims=True), approx=True)

    # per-pixel argmax disparity (first index on ties), from raw preds
    d_iota = lax.broadcasted_iota(jnp.int32, praw.shape, 0)
    mx = jnp.max(praw, axis=0, keepdims=True)
    first = jnp.min(jnp.where(praw == mx, d_iota, D), axis=0, keepdims=True)
    mask = d_iota == first                                        # (D, HW)

    # grouped softmax over all pixels whose argmax equals d (empty class -> 0)
    m = jnp.max(jnp.where(mask, psoft, -jnp.inf), axis=1, keepdims=True)
    ew = jnp.where(mask, jnp.exp(psoft - m), 0.0)
    s = jnp.sum(ew, axis=1, keepdims=True)
    inv_s = pl.reciprocal(jnp.where(s > 0, s, 1.0), approx=True)
    w = jnp.where(s > 0, ew * inv_s, 0.0)                         # (D, HW)

    w_ref[0] = w.astype(w_ref.dtype)


# ----------------------------------------------------------------------------
# Kernel 2: key / value projections, chunked over N (no resident (C, N) slab).
#   Outputs: kT (B, T, N)  lane-dense;  vN (B, N, T)  pre-transposed so the
#   attention PV matmul needs no per-tile transpose (one O(T*N) transpose per
#   batch total, done chunk-by-chunk here).
# ----------------------------------------------------------------------------
def _kv_projection_kernel(x_ref, w_ref, wkv1, bkv1, wk2, bk2, kT_ref, vN_ref):
    T = wk2.shape[0]
    xb = x_ref[0]                                     # (C, tkv) bf16
    wgt = w_ref[0]                                    # (1, tkv) bf16
    key = xb * (1.0 + wgt)                            # (C, tkv) bf16

    # merged key/value first projection: (2T, C) @ (C, tkv) -> (2T, tkv)
    kv1 = jnp.maximum(
        jnp.dot(wkv1[...], key, preferred_element_type=jnp.float32)
        + bkv1[...], 0.0)
    # value chunk: small (T, tkv) -> (tkv, T) transpose (XLU), then store
    vN_ref[0] = kv1[T:, :].T.astype(vN_ref.dtype)     # (tkv, T)

    k1 = kv1[:T, :].astype(jnp.bfloat16)              # (T, tkv)
    kT = jnp.maximum(
        jnp.dot(wk2[...], k1, preferred_element_type=jnp.float32)
        + bk2[...], 0.0)
    kT_ref[0] = kT.astype(kT_ref.dtype)               # (T, tkv)


# ----------------------------------------------------------------------------
# Kernel 3: cross attention over lane-aligned query tiles.
#   Grid = (B, N // tq); kT / vN are per-batch resident inputs (index map
#   constant in qi -> fetched once per batch), x and out are (C, tq) tiles.
# ----------------------------------------------------------------------------
def _attention_kernel(x_ref, kT_ref, vN_ref,
                      wq1, bq1, wq2, bq2, wo, bo, out_ref):
    xq = x_ref[0]                                      # (C, tq) bf16
    q1 = jnp.maximum(
        jnp.dot(wq1[...], xq, preferred_element_type=jnp.float32)
        + bq1[...], 0.0).astype(jnp.bfloat16)          # (T, tq)
    qT = jnp.maximum(
        jnp.dot(wq2[...], q1, preferred_element_type=jnp.float32)
        + bq2[...], 0.0).astype(jnp.bfloat16)          # (T, tq); T**-0.5 folded

    # sim[i, j] = sum_t qT[t, i] * kT[t, j]   (scale already applied)
    sim = lax.dot_general(qT, kT_ref[0], (((0,), (0,)), ((), ())),
                          preferred_element_type=jnp.float32)      # (tq, N) f32

    # softmax over keys: f32 max / denominator, bf16 exp + normalize
    m = jnp.max(sim, axis=-1, keepdims=True)                       # f32
    es = jnp.exp((sim - m).astype(jnp.bfloat16))                   # (tq, N) bf16
    denom = jnp.sum(es, axis=-1, keepdims=True, dtype=jnp.float32)
    inv = pl.reciprocal(denom, approx=True).astype(jnp.bfloat16)
    attn = es * inv                                                # (tq, N) bf16

    # PV: plain matmul, v is pre-transposed to (N, T) by the KV kernel
    ctx = jnp.dot(attn, vN_ref[0],
                  preferred_element_type=jnp.float32)              # (tq, T)

    # out[c, i] = sum_t wo[c, t] * ctx[i, t]  (only a small (tq, T) relayout)
    out = lax.dot_general(wo[...], ctx.astype(jnp.bfloat16),
                          (((1,), (1,)), ((), ())),
                          preferred_element_type=jnp.float32)      # (C, tq)
    out = jnp.maximum(out + bo[...], 0.0)
    out_ref[0] = out.astype(out_ref.dtype)


# ----------------------------------------------------------------------------
# Tiling helpers (VMEM-aware)
# ----------------------------------------------------------------------------
_LANE_TILES = (512, 256, 128)
# Budget for the attention kernel's working set: leaves headroom under v7x's
# 64 MiB physical VMEM; v5e/v6e have 128 MiB physical (defaults raised via
# vmem_limit_bytes below).
_VMEM_BUDGET_BYTES = 40 << 20


def _kv_tile(N):
    for t in _LANE_TILES:
        if N % t == 0:
            return t
    return N


def _attn_vmem_bytes(tq, N, C, T, out_itemsize):
    return (2 * C * tq * 2                 # x tile (bf16), double-buffered
            + 2 * C * tq * out_itemsize    # out tile, double-buffered
            + 2 * 2 * T * N * 2            # kT + vN resident (bf16), double-buffered
            + tq * N * 12                  # sim f32 + es/attn bf16 + f32 sum upcast
            + 4 * (T * C + T * T + C * T) * 2 + 6 * max(C, T) * 4)  # weights/biases


def _attn_tile(N, C, T, out_itemsize, budget_bytes):
    divisible = [t for t in _LANE_TILES if N % t == 0]
    if not divisible:
        return N                            # single full-width tile
    for t in divisible:
        if _attn_vmem_bytes(t, N, C, T, out_itemsize) <= budget_bytes:
            return t
    return divisible[-1]                    # smallest lane-aligned tile


# ----------------------------------------------------------------------------
# Wrapper
# ----------------------------------------------------------------------------
def semantic_level_context(x, preds, params):
    B, C, D, H, W = x.shape
    HW = H * W
    N = D * HW
    T = params["wq1"].shape[1]

    # ---- pass 1: tiny grouped-softmax weight map (B, D, HW), bf16 ---------
    p3 = preds.reshape(B, D, HW)
    w = pl.pallas_call(
        _semantic_weight_kernel,
        out_shape=jax.ShapeDtypeStruct((B, D, HW), jnp.bfloat16),
        grid=(B,),
        in_specs=[pl.BlockSpec((1, D, HW), lambda b: (b, 0, 0))],
        out_specs=pl.BlockSpec((1, D, HW), lambda b: (b, 0, 0)),
        compiler_params=pltpu.CompilerParams(dimension_semantics=("parallel",)),
    )(p3)

    # free, contiguous reshapes; x fed to both kernels as bf16 (halves the
    # per-tile DMA and VMEM for every block; no HBM transposes anywhere)
    w_flat = w.reshape(B, 1, N)
    x_chan = x.reshape(B, C, N).astype(jnp.bfloat16)

    # ---- parameter prep: (cout, cin) transposed, T**-0.5 folded into q2
    #      (ReLU is positively homogeneous), k1/v merged into one matmul,
    #      weights bf16, biases f32 column vectors ---------------------------
    scale = 1.0 / float(T) ** 0.5
    wdt = jnp.bfloat16
    wq1T = params["wq1"].T.astype(wdt)                              # (T, C)
    bq1c = params["bq1"].reshape(T, 1)
    wq2T = (params["wq2"] * scale).T.astype(wdt)                    # (T, T)
    bq2c = (params["bq2"] * scale).reshape(T, 1)
    wkv1T = jnp.concatenate([params["wk1"], params["wv"]], axis=1).T.astype(wdt)  # (2T, C)
    bkv1c = jnp.concatenate([params["bk1"], params["bv"]], axis=1).reshape(2 * T, 1)
    wk2T = params["wk2"].T.astype(wdt)                              # (T, T)
    bk2c = params["bk2"].reshape(T, 1)
    woT = params["wo"].T.astype(wdt)                                # (C, T)
    boc = params["bo"].reshape(C, 1)

    full2 = lambda a: pl.BlockSpec(a.shape, lambda b, i: (0, 0))

    # ---- pass 2: key / value projections, chunked over N ------------------
    tkv = _kv_tile(N)
    kv_args = (wkv1T, bkv1c, wk2T, bk2c)
    kT, vN = pl.pallas_call(
        _kv_projection_kernel,
        out_shape=(jax.ShapeDtypeStruct((B, T, N), jnp.bfloat16),
                   jax.ShapeDtypeStruct((B, N, T), jnp.bfloat16)),
        grid=(B, N // tkv),
        in_specs=[pl.BlockSpec((1, C, tkv), lambda b, k: (b, 0, k)),
                  pl.BlockSpec((1, 1, tkv), lambda b, k: (b, 0, k))]
                 + [full2(a) for a in kv_args],
        out_specs=(pl.BlockSpec((1, T, tkv), lambda b, k: (b, 0, k)),   # lane-dense k
                   pl.BlockSpec((1, tkv, T), lambda b, k: (b, k, 0))),  # pre-transposed v
        compiler_params=pltpu.CompilerParams(
            dimension_semantics=("parallel", "parallel")),
    )(x_chan, w_flat, *kv_args)

    # ---- pass 3: attention over lane-aligned query tiles -------------------
    out_itemsize = jnp.dtype(x.dtype).itemsize
    tq = _attn_tile(N, C, T, out_itemsize, _VMEM_BUDGET_BYTES)
    est = _attn_vmem_bytes(tq, N, C, T, out_itemsize)
    # explicit scoped-VMEM limit: above v5e's 16 MiB default, with ~30%
    # headroom; the tq budget keeps the footprint under v7x's 64 MiB physical.
    vmem_limit = int(max(32 << 20, min(est * 13 // 10, 112 << 20)))

    q_args = (wq1T, bq1c, wq2T, bq2c, woT, boc)
    out = pl.pallas_call(
        _attention_kernel,
        out_shape=jax.ShapeDtypeStruct((B, C, N), x.dtype),
        grid=(B, N // tq),
        in_specs=[pl.BlockSpec((1, C, tq), lambda b, q: (b, 0, q)),   # query tile
                  pl.BlockSpec((1, T, N), lambda b, q: (b, 0, 0)),    # kT, per-batch resident
                  pl.BlockSpec((1, N, T), lambda b, q: (b, 0, 0))]    # vN, per-batch resident
                 + [full2(a) for a in q_args],
        out_specs=pl.BlockSpec((1, C, tq), lambda b, q: (b, 0, q)),   # lane-dense
        compiler_params=pltpu.CompilerParams(
            dimension_semantics=("parallel", "parallel"),
            vmem_limit_bytes=vmem_limit),
    )(x_chan, kT, vN, *q_args)

    return out.reshape(B, C, D, H, W)


# ----------------------------------------------------------------------------
# Deterministic synthetic parameters (Conv1x1 + eval-mode BN folded together)
# ----------------------------------------------------------------------------
def init_params(key, C, T):
    eps = 1e-5

    def conv_bn(k, cin, cout):
        k1, k2, k3, k4, k5 = jax.random.split(k, 5)
        w = jax.random.normal(k1, (cin, cout), jnp.float32) / np.sqrt(cin)
        b = 0.01 * jax.random.normal(k2, (cout,), jnp.float32)
        gamma = 1.0 + 0.1 * jax.random.normal(k3, (cout,), jnp.float32)
        beta = 0.1 * jax.random.normal(k4, (cout,), jnp.float32)
        mean = 0.1 * jax.random.normal(k5, (cout,), jnp.float32)
        var = jnp.ones((cout,), jnp.float32)
        scale = gamma / jnp.sqrt(var + eps)
        return w * scale[None, :], ((b - mean) * scale + beta).reshape(1, cout)

    ks = jax.random.split(key, 6)
    p = {}
    p["wq1"], p["bq1"] = conv_bn(ks[0], C, T)
    p["wq2"], p["bq2"] = conv_bn(ks[1], T, T)
    p["wk1"], p["bk1"] = conv_bn(ks[2], C, T)
    p["wk2"], p["bk2"] = conv_bn(ks[3], T, T)
    p["wv"], p["bv"] = conv_bn(ks[4], C, T)
    p["wo"], p["bo"] = conv_bn(ks[5], T, C)
    return p


# ----------------------------------------------------------------------------
# Pure-JAX f32 reference (same math) for a sanity check
# ----------------------------------------------------------------------------
def reference(x, preds, params):
    B, C, D, H, W = x.shape
    HW = H * W
    N = D * HW
    T = params["wq1"].shape[1]

    praw = preds.reshape(B, D, HW).astype(jnp.float32)
    p = jax.nn.softmax(praw, axis=1)
    d_iota = jnp.arange(D)[None, :, None]
    mx = jnp.max(praw, axis=1, keepdims=True)
    first = jnp.min(jnp.where(praw == mx, d_iota, D), axis=1, keepdims=True)
    mask = d_iota == first
    m = jnp.max(jnp.where(mask, p, -jnp.inf), axis=2, keepdims=True)
    ew = jnp.where(mask, jnp.exp(p - m), 0.0)
    s = jnp.sum(ew, axis=2, keepdims=True)
    w = jnp.where(s > 0, ew / jnp.where(s > 0, s, 1.0), 0.0)         # (B, D, HW)

    xf = x.reshape(B, C, D, HW).astype(jnp.float32)
    keyf = xf * (1.0 + w[:, None, :, :])

    q_in = xf.reshape(B, C, N).transpose(0, 2, 1)
    k_in = keyf.reshape(B, C, N).transpose(0, 2, 1)

    proj = lambda a, wm, bm: jnp.maximum(a @ wm + bm, 0.0)
    q = proj(proj(q_in, params["wq1"], params["bq1"]), params["wq2"], params["bq2"])
    k = proj(proj(k_in, params["wk1"], params["bk1"]), params["wk2"], params["bk2"])
    v = proj(k_in, params["wv"], params["bv"])

    sim = jnp.einsum("bnt,bmt->bnm", q, k) * (1.0 / float(T) ** 0.5)
    attn = jax.nn.softmax(sim, axis=-1)
    ctx = jnp.einsum("bnm,bmt->bnt", attn, v)
    out = proj(ctx, params["wo"], params["bo"])
    return out.transpose(0, 2, 1).reshape(B, C, D, H, W)


if __name__ == "__main__":
    B, C, D, H, W = 2, 32, 4, 8, 8       # feats_channels = 32
    T = 16                               # transform_channels = 16

    key = jax.random.PRNGKey(0)
    kx, kp, kw = jax.random.split(key, 3)
    x = jax.random.normal(kx, (B, C, D, H, W), jnp.float32)
    preds = jax.random.normal(kp, (B, D, H, W), jnp.float32)
    params = init_params(kw, C, T)

    out = jax.jit(semantic_level_context)(x, preds, params)
    out = jax.block_until_ready(out)

    # bf16 MXU operands / bf16 softmax elementwise / approx reciprocals vs.
    # an exact f32 reference -> allow ~1e-2-level relative error.
    ref = reference(x, preds, params)
    np.testing.assert_allclose(np.asarray(out), np.asarray(ref),
                               rtol=5e-2, atol=1.5e-1)
    print("KERNEL_OK")
</pallas_src>

<mosaic_0001>
module attributes {stable_mosaic.version = 11 : i64} {
  func.func @_semantic_weight_kernel(%arg0: i32, %arg1: memref<1x4x64xf32, #tpu.memory_space<vmem>>, %arg2: memref<1x4x64xbf16, #tpu.memory_space<vmem>>) attributes {dimension_semantics = [#tpu.dimension_semantics<parallel>], iteration_bounds = array<i64: 2>, scalar_prefetch = 0 : i64, scratch_operands = 0 : i64, tpu.core_type = #tpu.core_type<tc>, window_params = [{transform_indices = @transform_0, window_bounds = array<i64: 1, 4, 64>}, {transform_indices = @transform_1, window_bounds = array<i64: 1, 4, 64>}]} {
    %c0 = arith.constant 0 : index
    %c0_0 = arith.constant 0 : index
    %c0_1 = arith.constant 0 : index
    %0 = vector.load %arg1[%c0, %c0_0, %c0_1] : memref<1x4x64xf32, #tpu.memory_space<vmem>>, vector<1x4x64xf32>
    %1 = vector.shape_cast %0 : vector<1x4x64xf32> to vector<4x64xf32>
    %cst = arith.constant dense<0xFF800000> : vector<64xf32>
    %2 = vector.multi_reduction <maximumf>, %1, %cst [0] : vector<4x64xf32> to vector<64xf32>
    %3 = vector.shape_cast %2 : vector<64xf32> to vector<1x64xf32>
    %4 = vector.broadcast %3 : vector<1x64xf32> to vector<4x64xf32>
    %5 = arith.subf %1, %4 : vector<4x64xf32>
    %6 = math.exp %5 : vector<4x64xf32>
    %cst_2 = arith.constant dense<0.000000e+00> : vector<64xf32>
    %7 = vector.multi_reduction <add>, %6, %cst_2 [0] : vector<4x64xf32> to vector<64xf32>
    %8 = vector.shape_cast %7 : vector<64xf32> to vector<1x64xf32>
    %9 = tpu.reciprocal %8 {approx = true} : vector<1x64xf32> -> vector<1x64xf32>
    %10 = vector.broadcast %9 : vector<1x64xf32> to vector<4x64xf32>
    %11 = arith.mulf %6, %10 : vector<4x64xf32>
    %12 = tpu.iota {dimensions = array<i32: 0>} : vector<4x64xi32>
    %cst_3 = arith.constant dense<0xFF800000> : vector<64xf32>
    %13 = vector.multi_reduction <maximumf>, %1, %cst_3 [0] : vector<4x64xf32> to vector<64xf32>
    %14 = vector.shape_cast %13 : vector<64xf32> to vector<1x64xf32>
    %15 = vector.broadcast %14 : vector<1x64xf32> to vector<4x64xf32>
    %16 = arith.cmpf oeq, %1, %15 : vector<4x64xf32>
    %c4_i32 = arith.constant 4 : i32
    %17 = vector.broadcast %c4_i32 : i32 to vector<4x64xi32>
    %18 = arith.select %16, %12, %17 : vector<4x64xi1>, vector<4x64xi32>
    %cst_4 = arith.constant dense<2147483647> : vector<64xi32>
    %19 = vector.multi_reduction <minsi>, %18, %cst_4 [0] : vector<4x64xi32> to vector<64xi32>
    %20 = vector.shape_cast %19 : vector<64xi32> to vector<1x64xi32>
    %21 = vector.broadcast %20 : vector<1x64xi32> to vector<4x64xi32>
    %22 = arith.cmpi eq, %12, %21 : vector<4x64xi32>
    %cst_5 = arith.constant 0xFF800000 : f32
    %23 = vector.broadcast %cst_5 : f32 to vector<4x64xf32>
    %24 = arith.select %22, %11, %23 : vector<4x64xi1>, vector<4x64xf32>
    %cst_6 = arith.constant dense<0xFF800000> : vector<4xf32>
    %25 = vector.multi_reduction <maximumf>, %24, %cst_6 [1] : vector<4x64xf32> to vector<4xf32>
    %26 = vector.shape_cast %25 : vector<4xf32> to vector<4x1xf32>
    %27 = vector.broadcast %26 : vector<4x1xf32> to vector<4x64xf32>
    %28 = arith.subf %11, %27 : vector<4x64xf32>
    %29 = math.exp %28 : vector<4x64xf32>
    %cst_7 = arith.constant 0.000000e+00 : f32
    %30 = vector.broadcast %cst_7 : f32 to vector<4x64xf32>
    %31 = arith.select %22, %29, %30 : vector<4x64xi1>, vector<4x64xf32>
    %cst_8 = arith.constant dense<0.000000e+00> : vector<4xf32>
    %32 = vector.multi_reduction <add>, %31, %cst_8 [1] : vector<4x64xf32> to vector<4xf32>
    %33 = vector.shape_cast %32 : vector<4xf32> to vector<4x1xf32>
    %cst_9 = arith.constant 0.000000e+00 : f32
    %34 = vector.broadcast %cst_9 : f32 to vector<4x1xf32>
    %35 = arith.cmpf ogt, %33, %34 : vector<4x1xf32>
    %cst_10 = arith.constant 1.000000e+00 : f32
    %36 = vector.broadcast %cst_10 : f32 to vector<4x1xf32>
    %37 = arith.select %35, %33, %36 : vector<4x1xi1>, vector<4x1xf32>
    %38 = tpu.reciprocal %37 {approx = true} : vector<4x1xf32> -> vector<4x1xf32>
    %cst_11 = arith.constant 0.000000e+00 : f32
    %39 = vector.broadcast %cst_11 : f32 to vector<4x1xf32>
    %40 = arith.cmpf ogt, %33, %39 : vector<4x1xf32>
    %41 = vector.broadcast %38 : vector<4x1xf32> to vector<4x64xf32>
    %42 = arith.mulf %31, %41 : vector<4x64xf32>
    %cst_12 = arith.constant 0.000000e+00 : f32
    %43 = vector.shape_cast %40 : vector<4x1xi1> to vector<4x1xi1>
    %44 = vector.broadcast %43 : vector<4x1xi1> to vector<4x64xi1>
    %45 = vector.broadcast %cst_12 : f32 to vector<4x64xf32>
    %46 = arith.select %44, %42, %45 : vector<4x64xi1>, vector<4x64xf32>
    %47 = arith.truncf %46 : vector<4x64xf32> to vector<4x64xbf16>
    %c0_13 = arith.constant 0 : index
    %c0_14 = arith.constant 0 : index
    %c0_15 = arith.constant 0 : index
    %48 = vector.load %arg2[%c0_13, %c0_14, %c0_15] : memref<1x4x64xbf16, #tpu.memory_space<vmem>>, vector<1x4x64xbf16>
    %49 = vector.shape_cast %48 : vector<1x4x64xbf16> to vector<4x64xbf16>
    %50 = vector.shape_cast %47 : vector<4x64xbf16> to vector<1x4x64xbf16>
    tpu.vector_store %arg2[%c0_13, %c0_14, %c0_15], %50 {strides = array<i32>} : memref<1x4x64xbf16, #tpu.memory_space<vmem>>, vector<1x4x64xbf16>,
    return
  }
  func.func @transform_0(%arg0: i32) -> (i32, i32, i32) {
    %c0_i32 = arith.constant 0 : i32
    %c0_i32_0 = arith.constant 0 : i32
    %c0_i32_1 = arith.constant 0 : i32
    return %arg0, %c0_i32, %c0_i32_0 : i32, i32, i32
  }
  func.func @transform_1(%arg0: i32) -> (i32, i32, i32) {
    %c0_i32 = arith.constant 0 : i32
    %c0_i32_0 = arith.constant 0 : i32
    %c0_i32_1 = arith.constant 0 : i32
    return %arg0, %c0_i32, %c0_i32_0 : i32, i32, i32
  }
}

module attributes {stable_mosaic.version = 11 : i64} {
  func.func @_kv_projection_kernel(%arg0: i32, %arg1: i32, %arg2: memref<1x32x256xbf16, #tpu.memory_space<vmem>>, %arg3: memref<1x1x256xbf16, #tpu.memory_space<vmem>>, %arg4: memref<32x32xbf16, #tpu.memory_space<vmem>>, %arg5: memref<32x1xf32, #tpu.memory_space<vmem>>, %arg6: memref<16x16xbf16, #tpu.memory_space<vmem>>, %arg7: memref<16x1xf32, #tpu.memory_space<vmem>>, %arg8: memref<1x16x256xbf16, #tpu.memory_space<vmem>>, %arg9: memref<1x256x16xbf16, #tpu.memory_space<vmem>>) attributes {dimension_semantics = [#tpu.dimension_semantics<parallel>, #tpu.dimension_semantics<parallel>], iteration_bounds = array<i64: 2, 1>, scalar_prefetch = 0 : i64, scratch_operands = 0 : i64, tpu.core_type = #tpu.core_type<tc>, window_params = [{transform_indices = @transform_0, window_bounds = array<i64: 1, 32, 256>}, {transform_indices = @transform_1, window_bounds = array<i64: 1, 1, 256>}, {pipeline_mode = #tpu.pipeline_mode<synchronous>, transform_indices = @transform_2, window_bounds = array<i64: 32, 32>}, {pipeline_mode = #tpu.pipeline_mode<synchronous>, transform_indices = @transform_3, window_bounds = array<i64: 32, 1>}, {pipeline_mode = #tpu.pipeline_mode<synchronous>, transform_indices = @transform_4, window_bounds = array<i64: 16, 16>}, {pipeline_mode = #tpu.pipeline_mode<synchronous>, transform_indices = @transform_5, window_bounds = array<i64: 16, 1>}, {transform_indices = @transform_6, window_bounds = array<i64: 1, 16, 256>}, {transform_indices = @transform_7, window_bounds = array<i64: 1, 256, 16>}]} {
    %c0 = arith.constant 0 : index
    %c0_0 = arith.constant 0 : index
    %c0_1 = arith.constant 0 : index
    %0 = vector.load %arg2[%c0, %c0_0, %c0_1] : memref<1x32x256xbf16, #tpu.memory_space<vmem>>, vector<1x32x256xbf16>
    %1 = vector.shape_cast %0 : vector<1x32x256xbf16> to vector<32x256xbf16>
    %c0_2 = arith.constant 0 : index
    %c0_3 = arith.constant 0 : index
    %c0_4 = arith.constant 0 : index
    %2 = vector.load %arg3[%c0_2, %c0_3, %c0_4] : memref<1x1x256xbf16, #tpu.memory_space<vmem>>, vector<1x1x256xbf16>
    %3 = vector.shape_cast %2 : vector<1x1x256xbf16> to vector<1x256xbf16>
    %cst = arith.constant 1.000000e+00 : bf16
    %4 = vector.broadcast %cst : bf16 to vector<1x256xbf16>
    %5 = arith.addf %4, %3 : vector<1x256xbf16>
    %6 = vector.broadcast %5 : vector<1x256xbf16> to vector<32x256xbf16>
    %7 = arith.mulf %1, %6 : vector<32x256xbf16>
    %c0_5 = arith.constant 0 : index
    %c0_6 = arith.constant 0 : index
    %8 = vector.load %arg4[%c0_5, %c0_6] : memref<32x32xbf16, #tpu.memory_space<vmem>>, vector<32x32xbf16>
    %cst_7 = arith.constant dense<0.000000e+00> : vector<32x256xf32>
    %9 = tpu.matmul %8, %7, %cst_7 {dimension_numbers = #tpu.dot_dimension_numbers<[1], [0], [0], [1], [0, 0, 1, 1], [], []>} : vector<32x32xbf16>, vector<32x256xbf16>, vector<32x256xf32> -> vector<32x256xf32>
    %c0_8 = arith.constant 0 : index
    %c0_9 = arith.constant 0 : index
    %10 = vector.load %arg5[%c0_8, %c0_9] : memref<32x1xf32, #tpu.memory_space<vmem>>, vector<32x1xf32>
    %11 = vector.broadcast %10 : vector<32x1xf32> to vector<32x256xf32>
    %12 = arith.addf %9, %11 : vector<32x256xf32>
    %cst_10 = arith.constant 0.000000e+00 : f32
    %13 = vector.broadcast %cst_10 : f32 to vector<32x256xf32>
    %14 = arith.maximumf %12, %13 : vector<32x256xf32>
    %15 = vector.extract_strided_slice %14 {offsets = [16, 0], sizes = [16, 256], strides = [1, 1]} : vector<32x256xf32> to vector<16x256xf32>
    %16 = tpu.transpose %15, [1, 0] : vector<16x256xf32> -> vector<256x16xf32>
    %17 = arith.truncf %16 : vector<256x16xf32> to vector<256x16xbf16>
    %c0_11 = arith.constant 0 : index
    %c0_12 = arith.constant 0 : index
    %c0_13 = arith.constant 0 : index
    %18 = vector.load %arg9[%c0_11, %c0_12, %c0_13] : memref<1x256x16xbf16, #tpu.memory_space<vmem>>, vector<1x256x16xbf16>
    %19 = vector.shape_cast %18 : vector<1x256x16xbf16> to vector<256x16xbf16>
    %20 = vector.shape_cast %17 : vector<256x16xbf16> to vector<1x256x16xbf16>
    tpu.vector_store %arg9[%c0_11, %c0_12, %c0_13], %20 {strides = array<i32>} : memref<1x256x16xbf16, #tpu.memory_space<vmem>>, vector<1x256x16xbf16>,
    %21 = vector.extract_strided_slice %14 {offsets = [0, 0], sizes = [16, 256], strides = [1, 1]} : vector<32x256xf32> to vector<16x256xf32>
    %22 = arith.truncf %21 : vector<16x256xf32> to vector<16x256xbf16>
    %c0_14 = arith.constant 0 : index
    %c0_15 = arith.constant 0 : index
    %23 = vector.load %arg6[%c0_14, %c0_15] : memref<16x16xbf16, #tpu.memory_space<vmem>>, vector<16x16xbf16>
    %cst_16 = arith.constant dense<0.000000e+00> : vector<16x256xf32>
    %24 = tpu.matmul %23, %22, %cst_16 {dimension_numbers = #tpu.dot_dimension_numbers<[1], [0], [0], [1], [0, 0, 1, 1], [], []>} : vector<16x16xbf16>, vector<16x256xbf16>, vector<16x256xf32> -> vector<16x256xf32>
    %c0_17 = arith.constant 0 : index
    %c0_18 = arith.constant 0 : index
    %25 = vector.load %arg7[%c0_17, %c0_18] : memref<16x1xf32, #tpu.memory_space<vmem>>, vector<16x1xf32>
    %26 = vector.broadcast %25 : vector<16x1xf32> to vector<16x256xf32>
    %27 = arith.addf %24, %26 : vector<16x256xf32>
    %cst_19 = arith.constant 0.000000e+00 : f32
    %28 = vector.broadcast %cst_19 : f32 to vector<16x256xf32>
    %29 = arith.maximumf %27, %28 : vector<16x256xf32>
    %30 = arith.truncf %29 : vector<16x256xf32> to vector<16x256xbf16>
    %c0_20 = arith.constant 0 : index
    %c0_21 = arith.constant 0 : index
    %c0_22 = arith.constant 0 : index
    %31 = vector.load %arg8[%c0_20, %c0_21, %c0_22] : memref<1x16x256xbf16, #tpu.memory_space<vmem>>, vector<1x16x256xbf16>
    %32 = vector.shape_cast %31 : vector<1x16x256xbf16> to vector<16x256xbf16>
    %33 = vector.shape_cast %30 : vector<16x256xbf16> to vector<1x16x256xbf16>
    tpu.vector_store %arg8[%c0_20, %c0_21, %c0_22], %33 {strides = array<i32>} : memref<1x16x256xbf16, #tpu.memory_space<vmem>>, vector<1x16x256xbf16>,
    return
  }
  func.func @transform_0(%arg0: i32, %arg1: i32) -> (i32, i32, i32) {
    %c0_i32 = arith.constant 0 : i32
    %c0_i32_0 = arith.constant 0 : i32
    return %arg0, %c0_i32, %arg1 : i32, i32, i32
  }
  func.func @transform_1(%arg0: i32, %arg1: i32) -> (i32, i32, i32) {
    %c0_i32 = arith.constant 0 : i32
    %c0_i32_0 = arith.constant 0 : i32
    return %arg0, %c0_i32, %arg1 : i32, i32, i32
  }
  func.func @transform_2(%arg0: i32, %arg1: i32) -> (i32, i32) {
    %c0_i32 = arith.constant 0 : i32
    %c0_i32_0 = arith.constant 0 : i32
    %c0_i32_1 = arith.constant 0 : i32
    return %c0_i32, %c0_i32_0 : i32, i32
  }
  func.func @transform_3(%arg0: i32, %arg1: i32) -> (i32, i32) {
    %c0_i32 = arith.constant 0 : i32
    %c0_i32_0 = arith.constant 0 : i32
    %c0_i32_1 = arith.constant 0 : i32
    return %c0_i32, %c0_i32_0 : i32, i32
  }
  func.func @transform_4(%arg0: i32, %arg1: i32) -> (i32, i32) {
    %c0_i32 = arith.constant 0 : i32
    %c0_i32_0 = arith.constant 0 : i32
    %c0_i32_1 = arith.constant 0 : i32
    return %c0_i32, %c0_i32_0 : i32, i32
  }
  func.func @transform_5(%arg0: i32, %arg1: i32) -> (i32, i32) {
    %c0_i32 = arith.constant 0 : i32
    %c0_i32_0 = arith.constant 0 : i32
    %c0_i32_1 = arith.constant 0 : i32
    return %c0_i32, %c0_i32_0 : i32, i32
  }
  func.func @transform_6(%arg0: i32, %arg1: i32) -> (i32, i32, i32) {
    %c0_i32 = arith.constant 0 : i32
    %c0_i32_0 = arith.constant 0 : i32
    return %arg0, %c0_i32, %arg1 : i32, i32, i32
  }
  func.func @transform_7(%arg0: i32, %arg1: i32) -> (i32, i32, i32) {
    %c0_i32 = arith.constant 0 : i32
    %c0_i32_0 = arith.constant 0 : i32
    return %arg0, %arg1, %c0_i32 : i32, i32, i32
  }
}

module attributes {stable_mosaic.version = 11 : i64} {
  func.func @_attention_kernel(%arg0: i32, %arg1: i32, %arg2: memref<1x32x256xbf16, #tpu.memory_space<vmem>>, %arg3: memref<1x16x256xbf16, #tpu.memory_space<vmem>>, %arg4: memref<1x256x16xbf16, #tpu.memory_space<vmem>>, %arg5: memref<16x32xbf16, #tpu.memory_space<vmem>>, %arg6: memref<16x1xf32, #tpu.memory_space<vmem>>, %arg7: memref<16x16xbf16, #tpu.memory_space<vmem>>, %arg8: memref<16x1xf32, #tpu.memory_space<vmem>>, %arg9: memref<32x16xbf16, #tpu.memory_space<vmem>>, %arg10: memref<32x1xf32, #tpu.memory_space<vmem>>, %arg11: memref<1x32x256xf32, #tpu.memory_space<vmem>>) attributes {dimension_semantics = [#tpu.dimension_semantics<parallel>, #tpu.dimension_semantics<parallel>], iteration_bounds = array<i64: 2, 1>, scalar_prefetch = 0 : i64, scratch_operands = 0 : i64, tpu.core_type = #tpu.core_type<tc>, window_params = [{transform_indices = @transform_0, window_bounds = array<i64: 1, 32, 256>}, {transform_indices = @transform_1, window_bounds = array<i64: 1, 16, 256>}, {transform_indices = @transform_2, window_bounds = array<i64: 1, 256, 16>}, {pipeline_mode = #tpu.pipeline_mode<synchronous>, transform_indices = @transform_3, window_bounds = array<i64: 16, 32>}, {pipeline_mode = #tpu.pipeline_mode<synchronous>, transform_indices = @transform_4, window_bounds = array<i64: 16, 1>}, {pipeline_mode = #tpu.pipeline_mode<synchronous>, transform_indices = @transform_5, window_bounds = array<i64: 16, 16>}, {pipeline_mode = #tpu.pipeline_mode<synchronous>, transform_indices = @transform_6, window_bounds = array<i64: 16, 1>}, {pipeline_mode = #tpu.pipeline_mode<synchronous>, transform_indices = @transform_7, window_bounds = array<i64: 32, 16>}, {pipeline_mode = #tpu.pipeline_mode<synchronous>, transform_indices = @transform_8, window_bounds = array<i64: 32, 1>}, {transform_indices = @transform_9, window_bounds = array<i64: 1, 32, 256>}]} {
    %c0 = arith.constant 0 : index
    %c0_0 = arith.constant 0 : index
    %c0_1 = arith.constant 0 : index
    %0 = vector.load %arg2[%c0, %c0_0, %c0_1] : memref<1x32x256xbf16, #tpu.memory_space<vmem>>, vector<1x32x256xbf16>
    %1 = vector.shape_cast %0 : vector<1x32x256xbf16> to vector<32x256xbf16>
    %c0_2 = arith.constant 0 : index
    %c0_3 = arith.constant 0 : index
    %2 = vector.load %arg5[%c0_2, %c0_3] : memref<16x32xbf16, #tpu.memory_space<vmem>>, vector<16x32xbf16>
    %cst = arith.constant dense<0.000000e+00> : vector<16x256xf32>
    %3 = tpu.matmul %2, %1, %cst {dimension_numbers = #tpu.dot_dimension_numbers<[1], [0], [0], [1], [0, 0, 1, 1], [], []>} : vector<16x32xbf16>, vector<32x256xbf16>, vector<16x256xf32> -> vector<16x256xf32>
    %c0_4 = arith.constant 0 : index
    %c0_5 = arith.constant 0 : index
    %4 = vector.load %arg6[%c0_4, %c0_5] : memref<16x1xf32, #tpu.memory_space<vmem>>, vector<16x1xf32>
    %5 = vector.broadcast %4 : vector<16x1xf32> to vector<16x256xf32>
    %6 = arith.addf %3, %5 : vector<16x256xf32>
    %cst_6 = arith.constant 0.000000e+00 : f32
    %7 = vector.broadcast %cst_6 : f32 to vector<16x256xf32>
    %8 = arith.maximumf %6, %7 : vector<16x256xf32>
    %9 = arith.truncf %8 : vector<16x256xf32> to vector<16x256xbf16>
    %c0_7 = arith.constant 0 : index
    %c0_8 = arith.constant 0 : index
    %10 = vector.load %arg7[%c0_7, %c0_8] : memref<16x16xbf16, #tpu.memory_space<vmem>>, vector<16x16xbf16>
    %cst_9 = arith.constant dense<0.000000e+00> : vector<16x256xf32>
    %11 = tpu.matmul %10, %9, %cst_9 {dimension_numbers = #tpu.dot_dimension_numbers<[1], [0], [0], [1], [0, 0, 1, 1], [], []>} : vector<16x16xbf16>, vector<16x256xbf16>, vector<16x256xf32> -> vector<16x256xf32>
    %c0_10 = arith.constant 0 : index
    %c0_11 = arith.constant 0 : index
    %12 = vector.load %arg8[%c0_10, %c0_11] : memref<16x1xf32, #tpu.memory_space<vmem>>, vector<16x1xf32>
    %13 = vector.broadcast %12 : vector<16x1xf32> to vector<16x256xf32>
    %14 = arith.addf %11, %13 : vector<16x256xf32>
    %cst_12 = arith.constant 0.000000e+00 : f32
    %15 = vector.broadcast %cst_12 : f32 to vector<16x256xf32>
    %16 = arith.maximumf %14, %15 : vector<16x256xf32>
    %17 = arith.truncf %16 : vector<16x256xf32> to vector<16x256xbf16>
    %c0_13 = arith.constant 0 : index
    %c0_14 = arith.constant 0 : index
    %c0_15 = arith.constant 0 : index
    %18 = vector.load %arg3[%c0_13, %c0_14, %c0_15] : memref<1x16x256xbf16, #tpu.memory_space<vmem>>, vector<1x16x256xbf16>
    %19 = vector.shape_cast %18 : vector<1x16x256xbf16> to vector<16x256xbf16>
    %cst_16 = arith.constant dense<0.000000e+00> : vector<256x256xf32>
    %20 = tpu.matmul %17, %19, %cst_16 {dimension_numbers = #tpu.dot_dimension_numbers<[0], [0], [1], [1], [0, 1, 1, 1], [], []>} : vector<16x256xbf16>, vector<16x256xbf16>, vector<256x256xf32> -> vector<256x256xf32>
    %cst_17 = arith.constant dense<0xFF800000> : vector<256xf32>
    %21 = vector.multi_reduction <maximumf>, %20, %cst_17 [1] : vector<256x256xf32> to vector<256xf32>
    %22 = vector.shape_cast %21 : vector<256xf32> to vector<256x1xf32>
    %23 = vector.broadcast %22 : vector<256x1xf32> to vector<256x256xf32>
    %24 = arith.subf %20, %23 : vector<256x256xf32>
    %25 = arith.truncf %24 : vector<256x256xf32> to vector<256x256xbf16>
    %26 = math.exp %25 : vector<256x256xbf16>
    %27 = arith.extf %26 : vector<256x256xbf16> to vector<256x256xf32>
    %cst_18 = arith.constant dense<0.000000e+00> : vector<256xf32>
    %28 = vector.multi_reduction <add>, %27, %cst_18 [1] : vector<256x256xf32> to vector<256xf32>
    %29 = vector.shape_cast %28 : vector<256xf32> to vector<256x1xf32>
    %30 = tpu.reciprocal %29 {approx = true} : vector<256x1xf32> -> vector<256x1xf32>
    %31 = arith.truncf %30 : vector<256x1xf32> to vector<256x1xbf16>
    %32 = vector.broadcast %31 : vector<256x1xbf16> to vector<256x256xbf16>
    %33 = arith.mulf %26, %32 : vector<256x256xbf16>
    %c0_19 = arith.constant 0 : index
    %c0_20 = arith.constant 0 : index
    %c0_21 = arith.constant 0 : index
    %34 = vector.load %arg4[%c0_19, %c0_20, %c0_21] : memref<1x256x16xbf16, #tpu.memory_space<vmem>>, vector<1x256x16xbf16>
    %35 = vector.shape_cast %34 : vector<1x256x16xbf16> to vector<256x16xbf16>
    %cst_22 = arith.constant dense<0.000000e+00> : vector<256x16xf32>
    %36 = tpu.matmul %33, %35, %cst_22 {dimension_numbers = #tpu.dot_dimension_numbers<[1], [0], [0], [1], [0, 0, 1, 1], [], []>} : vector<256x256xbf16>, vector<256x16xbf16>, vector<256x16xf32> -> vector<256x16xf32>
    %c0_23 = arith.constant 0 : index
    %c0_24 = arith.constant 0 : index
    %37 = vector.load %arg9[%c0_23, %c0_24] : memref<32x16xbf16, #tpu.memory_space<vmem>>, vector<32x16xbf16>
    %38 = arith.truncf %36 : vector<256x16xf32> to vector<256x16xbf16>
    %cst_25 = arith.constant dense<0.000000e+00> : vector<32x256xf32>
    %39 = tpu.matmul %37, %38, %cst_25 {dimension_numbers = #tpu.dot_dimension_numbers<[1], [1], [0], [0], [0, 0, 1, 0], [], []>} : vector<32x16xbf16>, vector<256x16xbf16>, vector<32x256xf32> -> vector<32x256xf32>
    %c0_26 = arith.constant 0 : index
    %c0_27 = arith.constant 0 : index
    %40 = vector.load %arg10[%c0_26, %c0_27] : memref<32x1xf32, #tpu.memory_space<vmem>>, vector<32x1xf32>
    %41 = vector.broadcast %40 : vector<32x1xf32> to vector<32x256xf32>
    %42 = arith.addf %39, %41 : vector<32x256xf32>
    %cst_28 = arith.constant 0.000000e+00 : f32
    %43 = vector.broadcast %cst_28 : f32 to vector<32x256xf32>
    %44 = arith.maximumf %42, %43 : vector<32x256xf32>
    %c0_29 = arith.constant 0 : index
    %c0_30 = arith.constant 0 : index
    %c0_31 = arith.constant 0 : index
    %45 = vector.load %arg11[%c0_29, %c0_30, %c0_31] : memref<1x32x256xf32, #tpu.memory_space<vmem>>, vector<1x32x256xf32>
    %46 = vector.shape_cast %45 : vector<1x32x256xf32> to vector<32x256xf32>
    %47 = vector.shape_cast %44 : vector<32x256xf32> to vector<1x32x256xf32>
    tpu.vector_store %arg11[%c0_29, %c0_30, %c0_31], %47 {strides = array<i32>} : memref<1x32x256xf32, #tpu.memory_space<vmem>>, vector<1x32x256xf32>,
    return
  }
  func.func @transform_0(%arg0: i32, %arg1: i32) -> (i32, i32, i32) {
    %c0_i32 = arith.constant 0 : i32
    %c0_i32_0 = arith.constant 0 : i32
    return %arg0, %c0_i32, %arg1 : i32, i32, i32
  }
  func.func @transform_1(%arg0: i32, %arg1: i32) -> (i32, i32, i32) {
    %c0_i32 = arith.constant 0 : i32
    %c0_i32_0 = arith.constant 0 : i32
    %c0_i32_1 = arith.constant 0 : i32
    return %arg0, %c0_i32, %c0_i32_0 : i32, i32, i32
  }
  func.func @transform_2(%arg0: i32, %arg1: i32) -> (i32, i32, i32) {
    %c0_i32 = arith.constant 0 : i32
    %c0_i32_0 = arith.constant 0 : i32
    %c0_i32_1 = arith.constant 0 : i32
    return %arg0, %c0_i32, %c0_i32_0 : i32, i32, i32
  }
  func.func @transform_3(%arg0: i32, %arg1: i32) -> (i32, i32) {
    %c0_i32 = arith.constant 0 : i32
    %c0_i32_0 = arith.constant 0 : i32
    %c0_i32_1 = arith.constant 0 : i32
    return %c0_i32, %c0_i32_0 : i32, i32
  }
  func.func @transform_4(%arg0: i32, %arg1: i32) -> (i32, i32) {
    %c0_i32 = arith.constant 0 : i32
    %c0_i32_0 = arith.constant 0 : i32
    %c0_i32_1 = arith.constant 0 : i32
    return %c0_i32, %c0_i32_0 : i32, i32
  }
  func.func @transform_5(%arg0: i32, %arg1: i32) -> (i32, i32) {
    %c0_i32 = arith.constant 0 : i32
    %c0_i32_0 = arith.constant 0 : i32
    %c0_i32_1 = arith.constant 0 : i32
    return %c0_i32, %c0_i32_0 : i32, i32
  }
  func.func @transform_6(%arg0: i32, %arg1: i32) -> (i32, i32) {
    %c0_i32 = arith.constant 0 : i32
    %c0_i32_0 = arith.constant 0 : i32
    %c0_i32_1 = arith.constant 0 : i32
    return %c0_i32, %c0_i32_0 : i32, i32
  }
  func.func @transform_7(%arg0: i32, %arg1: i32) -> (i32, i32) {
    %c0_i32 = arith.constant 0 : i32
    %c0_i32_0 = arith.constant 0 : i32
    %c0_i32_1 = arith.constant 0 : i32
    return %c0_i32, %c0_i32_0 : i32, i32
  }
  func.func @transform_8(%arg0: i32, %arg1: i32) -> (i32, i32) {
    %c0_i32 = arith.constant 0 : i32
    %c0_i32_0 = arith.constant 0 : i32
    %c0_i32_1 = arith.constant 0 : i32
    return %c0_i32, %c0_i32_0 : i32, i32
  }
  func.func @transform_9(%arg0: i32, %arg1: i32) -> (i32, i32, i32) {
    %c0_i32 = arith.constant 0 : i32
    %c0_i32_0 = arith.constant 0 : i32
    return %arg0, %c0_i32, %arg1 : i32, i32, i32
  }
}

</mosaic_0001>

<bundles_post_ra>
// kernel: semantic_level_context.3
= control target key start
LH: loop header
LB: loop body
LE: loop exit
PB: predicated region body
PF: predicated region fallthrough
CT: control target
= control target key end

     0   :  { %s265_s6 = smov 0   ;;  %s291_s0 = inlined_call_operand.vmem [shape: f32[2,4,64], index: 0, kind: input, shape index: {}]   ;;  %s292_s1 = inlined_call_operand.vmem [shape: bf16[2,4,64], index: 1, kind: output, shape index: {}]  }
   0x1 LB: > { %s222_s7 = sadd.s32 4294967295, %s253_s6   ;;  %p226_p0 = scmp.ge.s32.totalorder %s253_s6, 1  ;;  %s253_s6 = sphi %s265_s6, %s11_s6  }
   0x2   : > { %p86_p1 = scmp.lt.s32.totalorder %s253_s6, 3 }
   0x4   : > { %p87_p2 = pnand %p226_p0, %p86_p1 }
   0x5   : > { %p104_p3 = scmp.lt.s32.totalorder (!%p87_p2), %s222_s7, 1 }
   0x6   : > { %90 = sbr.rel (%p87_p2) target bundleno = 323 (0x143), region = 24 }
   0xb   : > { %s294_s7 = smov (!%p104_p3, %s222_s7), 1  ;;  %vm113_vm0 = vcmask 519168   ;;  %v133_v5 = vlaneseq  ;;  %vm167_vm7 = vcmask 517120  }
   0xc   : > { %s227_s8 = sshll.u32 %s294_s7, 2  ;;  %s228_s12 = sshll.u32 %s294_s7, 1 }
   0xd   : > { %s107_s11 = scalar_lea.vmem %s291_s0, %s227_s8  ;;  %v134_v8 = vshrl.u32 %v133_v5, 7  ;;  %s111_s15 = scalar_lea.vmem %s292_s1, %s228_s12 }
   0xe   : > { %v112_v0 = vld [vmem:[%s107_s11] sm:$0xf] }
   0xf   : > { %v114_v1 = vsel %vm113_vm0, %v112_v0, -inf }
  0x10   : > { %v115_v2 = vrot.slane %v114_v1, 4 }
  0x12   : > { %v116_v3 = vmax.f32 %v114_v1, %v115_v2 }
  0x14   : > { %v117_v4 = vrot.slane %v116_v3, 2 }
  0x16   : > { %v118_v6 = vmax.f32 %v116_v3, %v117_v4 }
  0x18   : > { %v119_v7 = vrot.slane %v118_v6, 1 }
  0x1a   : > { %v120_v9 = vmax.f32 %v118_v6, %v119_v7 }
  0x1c   : > { %v121_v10 = vsub.f32 %v112_v0, %v120_v9  ;;  %vm135_vm1 = vcmp.eq.f32.partialorder %v112_v0, %v120_v9 }
  0x1d   : > { %v136_v11 = vsel %vm135_vm1, %v134_v8, 4 }
  0x1e   : > { %v122_v12 = vmul.f32 1.442695, %v121_v10  ;;  %v137_v13 = vsel %vm113_vm0, %v136_v11, 2147483647 }
  0x1f   : > { %v138_v14 = vrot.slane %v137_v13, 4 }
  0x20   : > { %239 = vpow2.f32 %v122_v12 }
  0x21   : > { %vm139_vm2 = vcmp.lt.s32.totalorder %v137_v13, %v138_v14 }
  0x22   : > { %v140_v15 = vsel %vm139_vm2, %v137_v13, %v138_v14 }
  0x23   : > { %v141_v17 = vrot.slane %v140_v15, 2 }
  0x25   : > { %vm142_vm3 = vcmp.lt.s32.totalorder %v140_v15, %v141_v17 }
  0x26   : > { %v240_v16 = vpop.eup %239  ;;  %v143_v22 = vsel %vm142_vm3, %v140_v15, %v141_v17 }
  0x27   : > { %v124_v18 = vsel %vm113_vm0, %v240_v16, 0.0  ;;  %v144_v25 = vrot.slane %v143_v22, 1 }
  0x28   : > { %v125_v19 = vrot.slane %v124_v18, 4 }
  0x29   : > { %vm145_vm4 = vcmp.lt.s32.totalorder %v143_v22, %v144_v25 }
  0x2a   : > { %v126_v20 = vadd.f32 %v125_v19, %v124_v18  ;;  %v146_v27 = vsel %vm145_vm4, %v143_v22, %v144_v25 }
  0x2b   : > { %vm147_vm5 = vcmp.eq.s32.totalorder %v134_v8, %v146_v27 }
  0x2c   : > { %v127_v21 = vrot.slane %v126_v20, 2 }
  0x2e   : > { %v128_v23 = vadd.f32 %v127_v21, %v126_v20 }
  0x30   : > { %v129_v24 = vrot.slane %v128_v23, 1 }
  0x32   : > { %v130_v26 = vadd.f32 %v129_v24, %v128_v23 }
  0x34   : > { %241 = vrcp.f32 %v130_v26 }
  0x3a   : > { %v242_v28 = vpop.eup %241 }
  0x3b   : > { %v132_v29 = vmul.f32 %v242_v28, %v240_v16 }
  0x3d   : > { %v148_v30 = vsel %vm147_vm5, %v132_v29, -inf }
  0x3e   : > { %v149_v31 = vsel %vm113_vm0, %v148_v30, -inf }
  0x3f   : > { %150 = vmax.xlane.f32.xlu0 %v149_v31 }
  0xb2   : > { %v151_v32 = vpop.xlane.xlu0 %150 }
  0xb3   : > { %v152_v33 = vsub.f32 %v132_v29, %v151_v32 }
  0xb5   : > { %v153_v34 = vmul.f32 1.442695, %v152_v33 }
  0xb7   : > { %243 = vpow2.f32 %v153_v34 }
  0xbd   : > { %v244_v35 = vpop.eup %243 }
  0xbe   : > { %v155_v36 = vsel %vm147_vm5, %v244_v35, 0.0 }
  0xbf   : > { %v156_v37 = vsel %vm113_vm0, %v155_v36, 0.0 }
  0xc0   : > { %157 = vadd.xlane.f32.xlu0 %v156_v37 }
 0x133   : > { %v158_v38 = vpop.xlane.xlu0 %157 }
 0x134   : > { %vm159_vm6 = vcmp.gt.f32.partialorder %v158_v38, 0.0 }
 0x135   : > { %v160_v39 = vsel %vm159_vm6, %v158_v38, 1.0 }
 0x136   : > { %245 = vrcp.f32 %v160_v39 }
 0x13c   : > { %v246_v40 = vpop.eup %245 }
 0x13d   : > { %v162_v41 = vmul.f32 %v246_v40, %v155_v36 }
 0x13f   : > { %v165_v42 = vsel %vm159_vm6, %v162_v41, 0.0 }
 0x140   : > { %v166_v43 = vpack.c.bf16 %v165_v42, %v165_v42 }
 0x142   : > { %168 = vst.msk [vmem:[%s111_s15] sm:$0x3] %vm167_vm7, %v166_v43 }
 0x143 PF: > { %s11_s6 = sadd.s32 1, %s253_s6  }
 0x144   : > { %p8_p4 = scmp.ge.s32.totalorder %s11_s6, 4  }
 0x146   :  { %10 = sbr.rel (!%p8_p4) target bundleno = 1 (0x1), region = 54 }

// kernel: semantic_level_context.4
= control target key start
LH: loop header
LB: loop body
LE: loop exit
PB: predicated region body
PF: predicated region fallthrough
CT: control target
= control target key end

     0   :  { %s1072_s24 = smov 0   ;;  %s1074_s25 = smov 0   ;;  %s1210_s0 = inlined_call_operand.vmem [shape: bf16[2,32,256], index: 0, kind: input, shape index: {}]   ;;  %s1211_s1 = inlined_call_operand.vmem [shape: bf16[2,1,256], index: 1, kind: input, shape index: {}]   ;;  %s1212_s2 = inlined_call_operand.vmem [shape: bf16[32,32], index: 2, kind: input, shape index: {}]   ;;  %s1213_s3 = inlined_call_operand.vmem [shape: f32[32,1], index: 3, kind: input, shape index: {}]   ;;  %s1214_s4 = inlined_call_operand.vmem [shape: bf16[16,16], index: 4, kind: input, shape index: {}]   ;;  %s1215_s5 = inlined_call_operand.vmem [shape: f32[16,1], index: 5, kind: input, shape index: {}]   ;;  %s1216_s6 = inlined_call_operand.vmem [shape: bf16[2,16,256], index: 6, kind: output, shape index: {0}]   ;;  %s1217_s7 = inlined_call_operand.vmem [shape: bf16[2,256,16], index: 7, kind: output, shape index: {1}]  }
   0x1   :  { %s1076_s26 = smov 0  }
   0x2 LB: > { %s30_s27 = sadd.s32 1, %s1025_s25  ;;  %p861_p0 = scmp.ge.s32.totalorder %s1029_s26, 1  ;;  %s1029_s26 = sphi %s1076_s26, %s18_s26   ;;  %s1025_s25 = sphi %s1074_s25, %s1219_s25   ;;  %s1021_s24 = sphi %s1072_s24, %s1218_s24  }
   0x3   : > { %p32_p1 = scmp.ge.s32.totalorder %s30_s27, 2  ;;  %p279_p2 = scmp.lt.s32.totalorder %s1029_s26, 3 }
   0x5   : > { %s1221_s27 = smov (%p32_p1, %s30_s27), 0  ;;  %p280_p3 = pnand %p861_p0, %p279_p2 }
   0x6   : > { %p337_p4 = scmp.lt.s32.totalorder (!%p280_p3), %s1021_s24, 1 }
   0x7   : > { %283 = sbr.rel (%p280_p3) target bundleno = 473 (0x1d9), region = 44 }
   0xc   : > { %s1223_s24 = smov (!%p337_p4, %s1021_s24), 1  ;;  %v430_v0 = vld [vmem:[%s1213_s3 + $0x10] sm:$0xff]  ;;  %v428_v1 = vld [vmem:[%s1213_s3] sm:$0xff]  ;;  %v1031_v2 = vmov 0   ;;  %v431_v21 = vld [vmem:[%s1213_s3 + $0x18] sm:$0xff]  ;;  %vm462_vm0 = vcmask 261120  }
   0xd   : > { %s864_s28 = sshll.u32 %s1223_s24, 1  ;;  %922 = vset.pattern.permute.xlu1 %v1031_v2  ;;  %921 = vset.pattern.permute.xlu0 %v1031_v2  ;;  %s889_s13 = sshll.u32 %s1223_s24, 5  ;;  %v429_v22 = vld [vmem:[%s1213_s3 + $0x8] sm:$0xff]  ;;  %v892_v46 = vld [vmem:[%s1212_s2] sm:$0xff]  ;;  %vm665_vm1 = vcmask 130048   ;;  %vm611_vm2 = vcmask 125952  }
   0xe   : > { %s353_s12 = scalar_lea.vmem %s1211_s1, %s864_s28  ;;  %444 = vperm.xlu1 %922, %v430_v0   ;;  %434 = vperm.xlu0 %921, %v428_v1   ;;  %s344_s16 = scalar_lea.vmem %s1210_s0, %s889_s13  ;;  %v649_v43 = vld [vmem:[%s1215_s5 + $0x8] sm:$0xff]  ;;  %v648_v48 = vld [vmem:[%s1215_s5] sm:$0xff] }
   0xf   : > { %v380_v3 = vld [vmem:[%s353_s12] sm:$0x3]  ;;  %v378_v11 = vld [vmem:[%s344_s16 + $0x10] sm:$0xff]  ;;  %v379_v12 = vld [vmem:[%s344_s16 + $0x18] sm:$0xff]  ;;  %s890_s12 = sshll.u32 %s1223_s24, 4 }
  0x10   : > { %v381_v4 = vunpack.c.l.bf16 %v380_v3  ;;  %v376_v17 = vld [vmem:[%s344_s16] sm:$0xff]  ;;  %v377_v18 = vld [vmem:[%s344_s16 + $0x8] sm:$0xff]  ;;  %v406_v19 = vunpack.c.l.bf16 %v378_v11  ;;  %v408_v20 = vunpack.c.l.bf16 %v379_v12  ;;  %v407_v25 = vunpack.c.h.bf16 %v378_v11  ;;  %s363_s15 = scalar_lea.vmem %s1216_s6, %s890_s12  ;;  %s891_s16 = sshll.u32 %s1223_s24, 7 }
  0x11   : > { %v409_v26 = vunpack.c.h.bf16 %v379_v12  ;;  %v402_v27 = vunpack.c.l.bf16 %v376_v17  ;;  %v404_v28 = vunpack.c.l.bf16 %v377_v18  ;;  %v403_v29 = vunpack.c.h.bf16 %v376_v17  ;;  %v893_v47 = vld [vmem:[%s1212_s2 + $0x8] sm:$0xff]  ;;  %v894_v2 = vld [vmem:[%s1214_s4] sm:$0xff]  ;;  %s1135_s19 = scalar_lea.vmem %s1217_s7, %s891_s16 }
  0x12   : > { %v382_v5 = vadd.f32 1.0, %v381_v4  ;;  %v405_v30 = vunpack.c.h.bf16 %v377_v18 }
  0x14   : > { %v384_v6 = vperm.slane %v382_v5, 0  ;;  %v385_v7 = vperm.slane %v382_v5, 2 }
  0x16   : > { %v388_v8 = vpack.c.bf16 %v385_v7, %v384_v6  ;;  %449 = vperm.xlu1 %922, %v431_v21   ;;  %439 = vperm.xlu0 %921, %v429_v22  }
  0x18   : > { %v390_v9 = vunpack.c.l.b16 %v388_v8  ;;  %v391_v10 = vunpack.c.h.b16 %v388_v8 }
  0x1a   : > { %v392_v13 = vpack.c.b16 %v390_v9, %v390_v9  ;;  %v393_v14 = vpack.c.b16 %v391_v10, %v391_v10 }
  0x1c   : > { %v395_v15 = vpack.i.b16 %v392_v13, %v392_v13  ;;  %v399_v16 = vpack.i.b16 %v393_v14, %v393_v14 }
  0x1e   : > { %v397_v23 = vperm.slane %v395_v15, 0  ;;  %v401_v24 = vperm.slane %v399_v16, 0  ;;  %657 = vperm.xlu1 %922, %v649_v43   ;;  %652 = vperm.xlu0 %921, %v648_v48  }
  0x20   : > { %v410_v31 = vunpack.c.l.bf16 %v397_v23  ;;  %v411_v32 = vunpack.c.l.bf16 %v401_v24 }
  0x22   : > { %v416_v33 = vmul.f32 %v410_v31, %v406_v19  ;;  %v418_v34 = vmul.f32 %v410_v31, %v408_v20  ;;  %v417_v35 = vmul.f32 %v411_v32, %v407_v25  ;;  %v419_v36 = vmul.f32 %v411_v32, %v409_v26 }
  0x23   : > { %v412_v37 = vmul.f32 %v410_v31, %v402_v27  ;;  %v414_v38 = vmul.f32 %v410_v31, %v404_v28  ;;  %v413_v39 = vmul.f32 %v411_v32, %v403_v29  ;;  %v415_v40 = vmul.f32 %v411_v32, %v405_v30 }
  0x24   : > { %v422_v41 = vpack.c.bf16 %v418_v34, %v416_v33  ;;  %v423_v42 = vpack.c.bf16 %v419_v36, %v417_v35 }
  0x25   : > { %v420_v44 = vpack.c.bf16 %v414_v38, %v412_v37  ;;  %v421_v45 = vpack.c.bf16 %v415_v40, %v413_v39 }
  0x26   : > { %475 = vmatpush.bf16.msra.mxu0 %v422_v41  ;;  %494 = vmatpush.bf16.msra.mxu1 %v423_v42 }
  0x2a   : > { %476 = vmatpush.bf16.msra.mxu0 %v420_v44  ;;  %495 = vmatpush.bf16.msra.mxu1 %v421_v45 }
  0x2d   : > { %877 = vmatmul.msk.bf16.vlgmr.msra.gmra.mxu0 %vm462_vm0, %v892_v46  ;;  %879 = vmatmul.msk.bf16.vlgmr.msra.gmra.mxu1 %vm462_vm0, %v892_v46 }
  0x3d   : > { %878 = vmatmul.msk.bf16.gmra.mxu0 %vm462_vm0, %v893_v47  ;;  %880 = vmatmul.msk.bf16.gmra.mxu1 %vm462_vm0, %v893_v47 }
  0x80   : > { %v435_v49 = vpop.permute.xlu0 %434  ;;  %v445_v63 = vpop.permute.xlu1 %444 }
  0x88   : > { %v440_v52 = vpop.permute.xlu0 %439  ;;  %v450_v10 = vpop.permute.xlu1 %449 }
  0x90   : > { %v653_v18 = vpop.permute.xlu0 %652  ;;  %v658_v26 = vpop.permute.xlu1 %657 }
  0xaa   : > { %v478_v50 = vpop.f32.mrf.mxu0  ;;  %v497_v51 = vpop.f32.mrf.mxu1 }
  0xab   : > { %v479_v53 = vadd.f32 %v478_v50, %v435_v49  ;;  %v498_v54 = vadd.f32 %v497_v51, %v435_v49 }
  0xad   : > { %v507_v59 = vmax.f32 %v479_v53, 0.0  ;;  %v508_v60 = vmax.f32 %v498_v54, 0.0 }
  0xb2   : > { %v480_v55 = vpop.f32.mrf.mxu0  ;;  %v499_v56 = vpop.f32.mrf.mxu1 }
  0xb3   : > { %v481_v57 = vadd.f32 %v480_v55, %v440_v52  ;;  %v500_v58 = vadd.f32 %v499_v56, %v440_v52 }
  0xb5   : > { %v509_v61 = vmax.f32 %v481_v57, 0.0  ;;  %v510_v62 = vmax.f32 %v500_v58, 0.0 }
  0xb7   : > { %v644_v0 = vpack.c.bf16 %v509_v61, %v507_v59  ;;  %v645_v1 = vpack.c.bf16 %v510_v62, %v508_v60 }
  0xb9   : > { %676 = vmatpush.bf16.msra.mxu2 %v644_v0  ;;  %690 = vmatpush.bf16.msra.mxu3 %v645_v1 }
  0xba   : > { %v483_v3 = vpop.f32.mrf.mxu0  ;;  %v502_v4 = vpop.f32.mrf.mxu1 }
  0xbb   : > { %v484_v5 = vadd.f32 %v483_v3, %v445_v63  ;;  %v503_v6 = vadd.f32 %v502_v4, %v445_v63 }
  0xbc   : > { %885 = vmatmul.msk.bf16.vlgmr.msra.gmra.mxu2 %vm665_vm1, %v894_v2  ;;  %886 = vmatmul.msk.bf16.vlgmr.msra.gmra.mxu3 %vm665_vm1, %v894_v2 }
  0xbd   : > { %v511_v7 = vmax.f32 %v484_v5, 0.0  ;;  %v512_v8 = vmax.f32 %v503_v6, 0.0 }
  0xbf   : > { %v923_v9 = vpack.i.bf16 %v512_v8, %v511_v7 }
  0xc1   : > { %924 = vxpose.xlu2.b32.start [1/2] (short) %v923_v9, 128 }
  0xc2   : > { %v485_v11 = vpop.f32.mrf.mxu0  ;;  %v504_v12 = vpop.f32.mrf.mxu1 }
  0xc3   : > { %v486_v13 = vadd.f32 %v485_v11, %v450_v10  ;;  %v505_v14 = vadd.f32 %v504_v12, %v450_v10 }
  0xc5   : > { %v513_v15 = vmax.f32 %v486_v13, 0.0  ;;  %v514_v16 = vmax.f32 %v505_v14, 0.0 }
  0xc7   : > { %v925_v17 = vpack.i.bf16 %v514_v16, %v513_v15 }
  0xc9   : > { %926 = vxpose.xlu2.b32.end [2/2] (short) %v925_v17, 128 }
 0x13f   : > { %v678_v19 = vpop.f32.mrf.mxu2  ;;  %v692_v20 = vpop.f32.mrf.mxu3 }
 0x140   : > { %v679_v21 = vadd.f32 %v678_v19, %v653_v18  ;;  %v693_v22 = vadd.f32 %v692_v20, %v653_v18 }
 0x142   : > { %v697_v23 = vmax.f32 %v679_v21, 0.0  ;;  %v698_v24 = vmax.f32 %v693_v22, 0.0 }
 0x144   : > { %v701_v25 = vpack.c.bf16 %v698_v24, %v697_v23 }
 0x146   : > { %703 = vst [vmem:[%s363_s15] sm:$0xff] %v701_v25 }
 0x147   : > { %v680_v27 = vpop.f32.mrf.mxu2  ;;  %v694_v28 = vpop.f32.mrf.mxu3 }
 0x148   : > { %v681_v29 = vadd.f32 %v680_v27, %v658_v26  ;;  %v695_v30 = vadd.f32 %v694_v28, %v658_v26 }
 0x14a   : > { %v699_v31 = vmax.f32 %v681_v29, 0.0  ;;  %v700_v32 = vmax.f32 %v695_v30, 0.0 }
 0x14c   : > { %v702_v33 = vpack.c.bf16 %v700_v32, %v699_v31 }
 0x14e   : > { %704 = vst [vmem:[%s363_s15 + $0x8] sm:$0xff] %v702_v33 }
 0x15a   : > { %v927_v34 = vpop.trf.xlu2 }
 0x15b   : > { %v931_v35 = vunpack.i.h.bf16 %v927_v34  ;;  %v928_v36 = vunpack.i.l.bf16 %v927_v34 }
 0x15d   : > { %v595_v37 = vpack.c.bf16 %v931_v35, %v931_v35  ;;  %v579_v38 = vpack.c.bf16 %v928_v36, %v928_v36 }
 0x15f   : > { %628 = vst.msk [vmem:[%s1135_s19 + $0x40] sm:$0xf] %vm611_vm2, %v595_v37 }
 0x160   : > { %612 = vst.msk [vmem:[%s1135_s19] sm:$0xf] %vm611_vm2, %v579_v38 }
 0x162   : > { %v932_v39 = vpop.trf.xlu2 }
 0x163   : > { %v936_v40 = vunpack.i.h.bf16 %v932_v39  ;;  %v933_v41 = vunpack.i.l.bf16 %v932_v39 }
 0x165   : > { %v596_v42 = vpack.c.bf16 %v936_v40, %v936_v40  ;;  %v580_v43 = vpack.c.bf16 %v933_v41, %v933_v41 }
 0x167   : > { %629 = vst.msk [vmem:[%s1135_s19 + $0x44] sm:$0xf] %vm611_vm2, %v596_v42 }
 0x168   : > { %613 = vst.msk [vmem:[%s1135_s19 + $0x4] sm:$0xf] %vm611_vm2, %v580_v43 }
 0x16a   : > { %v937_v44 = vpop.trf.xlu2 }
 0x16b   : > { %v941_v45 = vunpack.i.h.bf16 %v937_v44  ;;  %v938_v46 = vunpack.i.l.bf16 %v937_v44 }
 0x16d   : > { %v597_v47 = vpack.c.bf16 %v941_v45, %v941_v45  ;;  %v581_v48 = vpack.c.bf16 %v938_v46, %v938_v46 }
 0x16f   : > { %630 = vst.msk [vmem:[%s1135_s19 + $0x48] sm:$0xf] %vm611_vm2, %v597_v47 }
 0x170   : > { %614 = vst.msk [vmem:[%s1135_s19 + $0x8] sm:$0xf] %vm611_vm2, %v581_v48 }
 0x172   : > { %v942_v49 = vpop.trf.xlu2 }
 0x173   : > { %v946_v50 = vunpack.i.h.bf16 %v942_v49  ;;  %v943_v51 = vunpack.i.l.bf16 %v942_v49 }
 0x175   : > { %v598_v52 = vpack.c.bf16 %v946_v50, %v946_v50  ;;  %v582_v53 = vpack.c.bf16 %v943_v51, %v943_v51 }
 0x177   : > { %631 = vst.msk [vmem:[%s1135_s19 + $0x4c] sm:$0xf] %vm611_vm2, %v598_v52 }
 0x178   : > { %615 = vst.msk [vmem:[%s1135_s19 + $0xc] sm:$0xf] %vm611_vm2, %v582_v53 }
 0x17a   : > { %v947_v54 = vpop.trf.xlu2 }
 0x17b   : > { %v951_v55 = vunpack.i.h.bf16 %v947_v54  ;;  %v948_v56 = vunpack.i.l.bf16 %v947_v54 }
 0x17d   : > { %v599_v57 = vpack.c.bf16 %v951_v55, %v951_v55  ;;  %v583_v58 = vpack.c.bf16 %v948_v56, %v948_v56 }
 0x17f   : > { %632 = vst.msk [vmem:[%s1135_s19 + $0x50] sm:$0xf] %vm611_vm2, %v599_v57 }
 0x180   : > { %616 = vst.msk [vmem:[%s1135_s19 + $0x10] sm:$0xf] %vm611_vm2, %v583_v58 }
 0x182   : > { %v952_v59 = vpop.trf.xlu2 }
 0x183   : > { %v956_v60 = vunpack.i.h.bf16 %v952_v59  ;;  %v953_v61 = vunpack.i.l.bf16 %v952_v59 }
 0x185   : > { %v600_v62 = vpack.c.bf16 %v956_v60, %v956_v60  ;;  %v584_v63 = vpack.c.bf16 %v953_v61, %v953_v61 }
 0x187   : > { %633 = vst.msk [vmem:[%s1135_s19 + $0x54] sm:$0xf] %vm611_vm2, %v600_v62 }
 0x188   : > { %617 = vst.msk [vmem:[%s1135_s19 + $0x14] sm:$0xf] %vm611_vm2, %v584_v63 }
 0x18a   : > { %v957_v0 = vpop.trf.xlu2 }
 0x18b   : > { %v961_v1 = vunpack.i.h.bf16 %v957_v0  ;;  %v958_v2 = vunpack.i.l.bf16 %v957_v0 }
 0x18d   : > { %v601_v3 = vpack.c.bf16 %v961_v1, %v961_v1  ;;  %v585_v4 = vpack.c.bf16 %v958_v2, %v958_v2 }
 0x18f   : > { %634 = vst.msk [vmem:[%s1135_s19 + $0x58] sm:$0xf] %vm611_vm2, %v601_v3 }
 0x190   : > { %618 = vst.msk [vmem:[%s1135_s19 + $0x18] sm:$0xf] %vm611_vm2, %v585_v4 }
 0x192   : > { %v962_v5 = vpop.trf.xlu2 }
 0x193   : > { %v966_v6 = vunpack.i.h.bf16 %v962_v5  ;;  %v963_v7 = vunpack.i.l.bf16 %v962_v5 }
 0x195   : > { %v602_v8 = vpack.c.bf16 %v966_v6, %v966_v6  ;;  %v586_v9 = vpack.c.bf16 %v963_v7, %v963_v7 }
 0x197   : > { %635 = vst.msk [vmem:[%s1135_s19 + $0x5c] sm:$0xf] %vm611_vm2, %v602_v8 }
 0x198   : > { %619 = vst.msk [vmem:[%s1135_s19 + $0x1c] sm:$0xf] %vm611_vm2, %v586_v9 }
 0x19a   : > { %v967_v10 = vpop.trf.xlu2 }
 0x19b   : > { %v971_v11 = vunpack.i.h.bf16 %v967_v10  ;;  %v968_v12 = vunpack.i.l.bf16 %v967_v10 }
 0x19d   : > { %v603_v13 = vpack.c.bf16 %v971_v11, %v971_v11  ;;  %v587_v14 = vpack.c.bf16 %v968_v12, %v968_v12 }
 0x19f   : > { %636 = vst.msk [vmem:[%s1135_s19 + $0x60] sm:$0xf] %vm611_vm2, %v603_v13 }
 0x1a0   : > { %620 = vst.msk [vmem:[%s1135_s19 + $0x20] sm:$0xf] %vm611_vm2, %v587_v14 }
 0x1a2   : > { %v972_v15 = vpop.trf.xlu2 }
 0x1a3   : > { %v976_v16 = vunpack.i.h.bf16 %v972_v15  ;;  %v973_v17 = vunpack.i.l.bf16 %v972_v15 }
 0x1a5   : > { %v604_v18 = vpack.c.bf16 %v976_v16, %v976_v16  ;;  %v588_v19 = vpack.c.bf16 %v973_v17, %v973_v17 }
 0x1a7   : > { %637 = vst.msk [vmem:[%s1135_s19 + $0x64] sm:$0xf] %vm611_vm2, %v604_v18 }
 0x1a8   : > { %621 = vst.msk [vmem:[%s1135_s19 + $0x24] sm:$0xf] %vm611_vm2, %v588_v19 }
 0x1aa   : > { %v977_v20 = vpop.trf.xlu2 }
 0x1ab   : > { %v981_v21 = vunpack.i.h.bf16 %v977_v20  ;;  %v978_v22 = vunpack.i.l.bf16 %v977_v20 }
 0x1ad   : > { %v605_v23 = vpack.c.bf16 %v981_v21, %v981_v21  ;;  %v589_v24 = vpack.c.bf16 %v978_v22, %v978_v22 }
 0x1af   : > { %638 = vst.msk [vmem:[%s1135_s19 + $0x68] sm:$0xf] %vm611_vm2, %v605_v23 }
 0x1b0   : > { %622 = vst.msk [vmem:[%s1135_s19 + $0x28] sm:$0xf] %vm611_vm2, %v589_v24 }
 0x1b2   : > { %v982_v25 = vpop.trf.xlu2 }
 0x1b3   : > { %v986_v26 = vunpack.i.h.bf16 %v982_v25  ;;  %v983_v27 = vunpack.i.l.bf16 %v982_v25 }
 0x1b5   : > { %v606_v28 = vpack.c.bf16 %v986_v26, %v986_v26  ;;  %v590_v29 = vpack.c.bf16 %v983_v27, %v983_v27 }
 0x1b7   : > { %639 = vst.msk [vmem:[%s1135_s19 + $0x6c] sm:$0xf] %vm611_vm2, %v606_v28 }
 0x1b8   : > { %623 = vst.msk [vmem:[%s1135_s19 + $0x2c] sm:$0xf] %vm611_vm2, %v590_v29 }
 0x1ba   : > { %v987_v30 = vpop.trf.xlu2 }
 0x1bb   : > { %v991_v31 = vunpack.i.h.bf16 %v987_v30  ;;  %v988_v32 = vunpack.i.l.bf16 %v987_v30 }
 0x1bd   : > { %v607_v33 = vpack.c.bf16 %v991_v31, %v991_v31  ;;  %v591_v34 = vpack.c.bf16 %v988_v32, %v988_v32 }
 0x1bf   : > { %640 = vst.msk [vmem:[%s1135_s19 + $0x70] sm:$0xf] %vm611_vm2, %v607_v33 }
 0x1c0   : > { %624 = vst.msk [vmem:[%s1135_s19 + $0x30] sm:$0xf] %vm611_vm2, %v591_v34 }
 0x1c2   : > { %v992_v35 = vpop.trf.xlu2 }
 0x1c3   : > { %v996_v36 = vunpack.i.h.bf16 %v992_v35  ;;  %v993_v37 = vunpack.i.l.bf16 %v992_v35 }
 0x1c5   : > { %v608_v38 = vpack.c.bf16 %v996_v36, %v996_v36  ;;  %v592_v39 = vpack.c.bf16 %v993_v37, %v993_v37 }
 0x1c7   : > { %641 = vst.msk [vmem:[%s1135_s19 + $0x74] sm:$0xf] %vm611_vm2, %v608_v38 }
 0x1c8   : > { %625 = vst.msk [vmem:[%s1135_s19 + $0x34] sm:$0xf] %vm611_vm2, %v592_v39 }
 0x1ca   : > { %v997_v40 = vpop.trf.xlu2 }
 0x1cb   : > { %v1001_v41 = vunpack.i.h.bf16 %v997_v40  ;;  %v998_v42 = vunpack.i.l.bf16 %v997_v40 }
 0x1cd   : > { %v609_v43 = vpack.c.bf16 %v1001_v41, %v1001_v41  ;;  %v593_v44 = vpack.c.bf16 %v998_v42, %v998_v42 }
 0x1cf   : > { %642 = vst.msk [vmem:[%s1135_s19 + $0x78] sm:$0xf] %vm611_vm2, %v609_v43 }
 0x1d0   : > { %626 = vst.msk [vmem:[%s1135_s19 + $0x38] sm:$0xf] %vm611_vm2, %v593_v44 }
 0x1d2   : > { %v1002_v45 = vpop.trf.xlu2 }
 0x1d3   : > { %v1006_v46 = vunpack.i.h.bf16 %v1002_v45  ;;  %v1003_v47 = vunpack.i.l.bf16 %v1002_v45 }
 0x1d5   : > { %v610_v48 = vpack.c.bf16 %v1006_v46, %v1006_v46  ;;  %v594_v49 = vpack.c.bf16 %v1003_v47, %v1003_v47 }
 0x1d7   : > { %643 = vst.msk [vmem:[%s1135_s19 + $0x7c] sm:$0xf] %vm611_vm2, %v610_v48 }
 0x1d8   : > { %627 = vst.msk [vmem:[%s1135_s19 + $0x3c] sm:$0xf] %vm611_vm2, %v594_v49 }
 0x1d9 PF: > { %s18_s26 = sadd.s32 1, %s1029_s26   ;;  %s1218_s24 = smov %s1025_s25 }
 0x1da   : > { %p15_p5 = scmp.ge.s32.totalorder %s18_s26, 4   ;;  %s1219_s25 = smov %s1221_s27 }
 0x1dc   :  { %17 = sbr.rel (!%p15_p5) target bundleno = 2 (0x2), region = 89 }

// kernel: semantic_level_context.5
= control target key start
LH: loop header
LB: loop body
LE: loop exit
PB: predicated region body
PF: predicated region fallthrough
CT: control target
= control target key end

     0   :  { %s2644_s30 = smov 0   ;;  %s2646_s10 = smov 0   ;;  %s3569_s0 = inlined_call_operand.vmem [shape: bf16[2,32,256], index: 0, kind: input, shape index: {}]   ;;  %s3570_s1 = inlined_call_operand.vmem [shape: bf16[2,16,256], index: 1, kind: input, shape index: {}]   ;;  %s3571_s2 = inlined_call_operand.vmem [shape: bf16[2,256,16], index: 2, kind: input, shape index: {}]   ;;  %s3572_s3 = inlined_call_operand.vmem [shape: bf16[16,32], index: 3, kind: input, shape index: {}]   ;;  %s3573_s4 = inlined_call_operand.vmem [shape: f32[16,1], index: 4, kind: input, shape index: {}]   ;;  %s3574_s5 = inlined_call_operand.vmem [shape: bf16[16,16], index: 5, kind: input, shape index: {}]   ;;  %s3575_s6 = inlined_call_operand.vmem [shape: f32[16,1], index: 6, kind: input, shape index: {}]   ;;  %s3576_s7 = inlined_call_operand.vmem [shape: bf16[32,16], index: 7, kind: input, shape index: {}]   ;;  %s3577_s8 = inlined_call_operand.vmem [shape: f32[32,1], index: 8, kind: input, shape index: {}]   ;;  %s3578_s9 = inlined_call_operand.vmem [shape: f32[2,32,256], index: 9, kind: output, shape index: {}]  }
   0x1   :  { %s2648_s11 = smov 0  }
   0x2 LB: > { %s31_s12 = sadd.s32 1, %s2587_s10  ;;  %p2164_p0 = scmp.ge.s32.totalorder %s2591_s11, 1  ;;  %s2591_s11 = sphi %s2648_s11, %s19_s11   ;;  %s2587_s10 = sphi %s2646_s10, %s3648_s10   ;;  %s2583_s30 = sphi %s2644_s30, %s3647_s30  }
   0x3   : > { %p33_p1 = scmp.ge.s32.totalorder %s31_s12, 2  ;;  %p328_p2 = scmp.lt.s32.totalorder %s2591_s11, 3 }
   0x5   : > { %s3650_s12 = smov (%p33_p1, %s31_s12), 0  ;;  %p329_p3 = pnand %p2164_p0, %p328_p2 }
   0x7   : > { %332 = sbr.rel (%p329_p3) target bundleno = 1739 (0x6cb), region = 56 }
   0xc   : > { %p383_p4 = scmp.lt.s32.totalorder %s2583_s30, 1  ;;  %v419_v0 = vld [vmem:[%s3573_s4] sm:$0xff]  ;;  %v2593_v1 = vmov 0   ;;  %v420_v2 = vld [vmem:[%s3573_s4 + $0x8] sm:$0xff]  ;;  %vm456_vm0 = vcmask 261120   ;;  %vm513_vm1 = vcmask 130048  }
   0xd   : > { %2374 = vset.pattern.permute.xlu0 %v2593_v1  ;;  %2375 = vset.pattern.permute.xlu1 %v2593_v1  ;;  %v2327_v15 = vld [vmem:[%s3572_s3] sm:$0xff]  ;;  %v497_v17 = vld [vmem:[%s3575_s6 + $0x8] sm:$0xff] }
   0xe   : > { %s3652_s30 = smov (!%p383_p4, %s2583_s30), 1  ;;  %423 = vperm.xlu0 %2374, %v419_v0   ;;  %v496_v16 = vld [vmem:[%s3575_s6] sm:$0xff] }
   0xf   : > { %s2319_s15 = sshll.u32 %s3652_s30, 5  ;;  %500 = vperm.xlu1 %2375, %v496_v16   ;;  %v2328_v34 = vld [vmem:[%s3574_s5] sm:$0xff]  ;;  %s2320_s29 = sshll.u32 %s3652_s30, 4 }
  0x10   : > { %s390_s18 = scalar_lea.vmem %s3569_s0, %s2319_s15  ;;  %s396_s15 = scalar_lea.vmem %s3570_s1, %s2320_s29 }
  0x11   : > { %v2187_v3 = vld [vmem:[%s390_s18 + $0x10] sm:$0xf]  ;;  %v2326_v4 = vld [vmem:[%s390_s18 + $0x14] sm:$0xf0]  ;;  %v2325_v5 = vld [vmem:[%s390_s18 + $0x14] sm:$0xf] }
  0x12   : > { %v2188_v6 = vor.u32 %v2326_v4, %v2187_v3  ;;  %v2189_v7 = vld [vmem:[%s390_s18 + $0x18] sm:$0xf0]  ;;  %v2179_v8 = vld [vmem:[%s390_s18] sm:$0xf]  ;;  %v2324_v9 = vld [vmem:[%s390_s18 + $0x4] sm:$0xf0] }
  0x13   : > { %v2192_v10 = vor.u32 %v2325_v5, %v2189_v7  ;;  %v2323_v11 = vld [vmem:[%s390_s18 + $0x4] sm:$0xf]  ;;  %v2181_v12 = vld [vmem:[%s390_s18 + $0x8] sm:$0xf0]  ;;  %v2180_v13 = vor.u32 %v2324_v9, %v2179_v8  ;;  %v2203_v35 = vld [vmem:[%s396_s15] sm:$0xf] }
  0x14   : > { %466 = vmatpush.bf16.msra.mxu0 %v2188_v6  ;;  %v2184_v14 = vor.u32 %v2323_v11, %v2181_v12  ;;  %v2330_v36 = vld [vmem:[%s396_s15 + $0x4] sm:$0xf0]  ;;  %v2329_v37 = vld [vmem:[%s396_s15 + $0x4] sm:$0xf]  ;;  %v2205_v39 = vld [vmem:[%s396_s15 + $0x8] sm:$0xf0] }
  0x15   : > { %480 = vmatpush.bf16.msra.mxu1 %v2192_v10  ;;  %v2204_v38 = vor.u32 %v2330_v36, %v2203_v35  ;;  %v2208_v40 = vor.u32 %v2329_v37, %v2205_v39  ;;  %s2321_s16 = sshll.u32 %s3652_s30, 7  ;;  %s2322_s13 = sshll.u32 %s3652_s30, 6 }
  0x16   : > { %428 = vperm.xlu0 %2374, %v420_v2   ;;  %s2947_s19 = scalar_lea.vmem %s3571_s2, %s2321_s16  ;;  %s3513_s16 = scalar_lea.vmem %s3578_s9, %s2322_s13 }
  0x17   : > { %505 = vperm.xlu1 %2375, %v497_v17  }
  0x18   : > { %467 = vmatpush.bf16.msra.mxu0 %v2180_v13 }
  0x19   : > { %481 = vmatpush.bf16.msra.mxu1 %v2184_v14 }
  0x1b   : > { %2193 = vmatmul.msk.bf16.vlgmr.msra.gmra.mxu0 %vm456_vm0, %v2327_v15 }
  0x1c   : > { %2194 = vmatmul.msk.bf16.vlgmr.msra.gmra.mxu1 %vm456_vm0, %v2327_v15 }
  0x80   : > { %v424_v18 = vpop.permute.xlu0 %423 }
  0x81   : > { %v501_v41 = vpop.permute.xlu1 %500 }
  0x88   : > { %v429_v22 = vpop.permute.xlu0 %428 }
  0x89   : > { %v506_v45 = vpop.permute.xlu1 %505 }
  0x98   : > { %v469_v19 = vpop.f32.mrf.mxu0 }
  0x99   : > { %v483_v20 = vpop.f32.mrf.mxu1  ;;  %v470_v21 = vadd.f32 %v469_v19, %v424_v18 }
  0x9a   : > { %v484_v23 = vadd.f32 %v483_v20, %v424_v18 }
  0x9b   : > { %v488_v28 = vmax.f32 %v470_v21, 0.0 }
  0x9c   : > { %v489_v30 = vmax.f32 %v484_v23, 0.0 }
  0xa0   : > { %v471_v24 = vpop.f32.mrf.mxu0 }
  0xa1   : > { %v472_v25 = vadd.f32 %v471_v24, %v429_v22  ;;  %v485_v26 = vpop.f32.mrf.mxu1 }
  0xa2   : > { %v486_v27 = vadd.f32 %v485_v26, %v429_v22 }
  0xa3   : > { %v490_v29 = vmax.f32 %v472_v25, 0.0 }
  0xa4   : > { %v491_v31 = vmax.f32 %v486_v27, 0.0 }
  0xa5   : > { %v492_v32 = vpack.c.bf16 %v490_v29, %v488_v28 }
  0xa6   : > { %v493_v33 = vpack.c.bf16 %v491_v31, %v489_v30 }
  0xa7   : > { %524 = vmatpush.bf16.msra.mxu2 %v492_v32 }
  0xa8   : > { %538 = vmatpush.bf16.msra.mxu3 %v493_v33 }
  0xaa   : > { %2199 = vmatmul.msk.bf16.vlgmr.msra.gmra.mxu2 %vm513_vm1, %v2328_v34 }
  0xab   : > { %2200 = vmatmul.msk.bf16.vlgmr.msra.gmra.mxu3 %vm513_vm1, %v2328_v34  ;;  %642 = vmatpush.bf16.msrb.mxu2 %v2204_v38 }
  0xac   : > { %731 = vmatpush.bf16.msrb.mxu3 %v2208_v40 }
 0x12d   : > { %v526_v42 = vpop.f32.mrf.mxu2 }
 0x12e   : > { %v540_v43 = vpop.f32.mrf.mxu3  ;;  %v527_v44 = vadd.f32 %v526_v42, %v501_v41 }
 0x12f   : > { %v541_v46 = vadd.f32 %v540_v43, %v501_v41 }
 0x130   : > { %v545_v51 = vmax.f32 %v527_v44, 0.0 }
 0x131   : > { %v546_v53 = vmax.f32 %v541_v46, 0.0 }
 0x135   : > { %v528_v47 = vpop.f32.mrf.mxu2 }
 0x136   : > { %v529_v48 = vadd.f32 %v528_v47, %v506_v45  ;;  %v542_v49 = vpop.f32.mrf.mxu3 }
 0x137   : > { %v543_v50 = vadd.f32 %v542_v49, %v506_v45 }
 0x138   : > { %v547_v52 = vmax.f32 %v529_v48, 0.0 }
 0x139   : > { %v548_v54 = vmax.f32 %v543_v50, 0.0 }
 0x13a   : > { %v549_v55 = vpack.c.bf16 %v547_v52, %v545_v51 }
 0x13b   : > { %v550_v56 = vpack.c.bf16 %v548_v54, %v546_v53 }
 0x13d   : > { %553 = vxpose.binary.xlu2.c.b16.start.end [1/2] (short) %v550_v56, %v549_v55, 128 }
 0x19f   : > { %2376 = vset.pattern.permute.xlu2 %v2593_v1 }
 0x1de   : > { %v561_v57 = vpop.trf.xlu2 }
 0x1df   : > { %2209 = vmatmul.msk.bf16.vlgmr.msrb.gmra.mxu2 %vm513_vm1, %v561_v57  ;;  %2225 = vmatmul.msk.bf16.vlgmr.msrb.gmra.mxu3 %vm513_vm1, %v561_v57 }
 0x1e6   : > { %v562_v58 = vpop.trf.xlu2 }
 0x1ee   : > { %v563_v59 = vpop.trf.xlu2 }
 0x1ef   : > { %2210 = vmatmul.msk.bf16.gmra.mxu2 %vm513_vm1, %v563_v59  ;;  %2226 = vmatmul.msk.bf16.gmra.mxu3 %vm513_vm1, %v563_v59 }
 0x1f6   : > { %v564_v60 = vpop.trf.xlu2 }
 0x1fe   : > { %v565_v61 = vpop.trf.xlu2 }
 0x1ff   : > { %2211 = vmatmul.msk.bf16.gmra.mxu2 %vm513_vm1, %v565_v61  ;;  %2227 = vmatmul.msk.bf16.gmra.mxu3 %vm513_vm1, %v565_v61 }
 0x206   : > { %v566_v62 = vpop.trf.xlu2 }
 0x20e   : > { %v567_v63 = vpop.trf.xlu2 }
 0x20f   : > { %2212 = vmatmul.msk.bf16.gmra.mxu2 %vm513_vm1, %v567_v63  ;;  %2228 = vmatmul.msk.bf16.gmra.mxu3 %vm513_vm1, %v567_v63 }
 0x216   : > { %v568_v0 = vpop.trf.xlu2 }
 0x21e   : > { %v569_v1 = vpop.trf.xlu2 }
 0x21f   : > { %2213 = vmatmul.msk.bf16.gmra.mxu2 %vm513_vm1, %v569_v1  ;;  %2229 = vmatmul.msk.bf16.gmra.mxu3 %vm513_vm1, %v569_v1 }
 0x226   : > { %v570_v2 = vpop.trf.xlu2 }
 0x22e   : > { %v571_v3 = vpop.trf.xlu2 }
 0x22f   : > { %2214 = vmatmul.msk.bf16.gmra.mxu2 %vm513_vm1, %v571_v3  ;;  %2230 = vmatmul.msk.bf16.gmra.mxu3 %vm513_vm1, %v571_v3 }
 0x236   : > { %v572_v4 = vpop.trf.xlu2 }
 0x23e   : > { %v573_v5 = vpop.trf.xlu2 }
 0x23f   : > { %2215 = vmatmul.msk.bf16.gmra.mxu2 %vm513_vm1, %v573_v5  ;;  %2231 = vmatmul.msk.bf16.gmra.mxu3 %vm513_vm1, %v573_v5 }
 0x246   : > { %v574_v6 = vpop.trf.xlu2 }
 0x24e   : > { %v575_v7 = vpop.trf.xlu2 }
 0x24f   : > { %2216 = vmatmul.msk.bf16.gmra.mxu2 %vm513_vm1, %v575_v7  ;;  %2232 = vmatmul.msk.bf16.gmra.mxu3 %vm513_vm1, %v575_v7 }
 0x256   : > { %v576_v44 = vpop.trf.xlu2 }
 0x25f   : > { %2217 = vmatmul.msk.bf16.gmra.mxu2 %vm513_vm1, %v562_v58  ;;  %2233 = vmatmul.msk.bf16.gmra.mxu3 %vm513_vm1, %v562_v58 }
 0x262   : > { %v2713_v8 = vpop.f32.mrf.mxu2  ;;  %v2715_v9 = vpop.f32.mrf.mxu3 }
 0x263   : > { %v813_v10 = vmax.f32 %v2713_v8, %v2715_v9 }
 0x265   : > { %814 = vmax.xlane.f32.xlu2 %v813_v10 }
 0x26a   : > { %v2719_v11 = vpop.f32.mrf.mxu2  ;;  %v2721_v12 = vpop.f32.mrf.mxu3 }
 0x26b   : > { %v816_v13 = vmax.f32 %v2719_v11, %v2721_v12 }
 0x26d   : > { %817 = vmax.xlane.f32.xlu0 %v816_v13 }
 0x26f   : > { %2218 = vmatmul.msk.bf16.gmra.mxu2 %vm513_vm1, %v564_v60  ;;  %2234 = vmatmul.msk.bf16.gmra.mxu3 %vm513_vm1, %v564_v60 }
 0x272   : > { %v2727_v14 = vpop.f32.mrf.mxu2  ;;  %v2729_v15 = vpop.f32.mrf.mxu3 }
 0x273   : > { %v819_v16 = vmax.f32 %v2727_v14, %v2729_v15 }
 0x275   : > { %820 = vmax.xlane.f32.xlu1 %v819_v16 }
 0x27a   : > { %v2733_v17 = vpop.f32.mrf.mxu2  ;;  %v2735_v18 = vpop.f32.mrf.mxu3 }
 0x27b   : > { %v822_v19 = vmax.f32 %v2733_v17, %v2735_v18 }
 0x27d   : > { %823 = vmax.xlane.f32.xlu0 %v822_v19 }
 0x27f   : > { %2219 = vmatmul.msk.bf16.gmra.mxu2 %vm513_vm1, %v566_v62  ;;  %2235 = vmatmul.msk.bf16.gmra.mxu3 %vm513_vm1, %v566_v62 }
 0x282   : > { %v2741_v20 = vpop.f32.mrf.mxu2  ;;  %v2743_v21 = vpop.f32.mrf.mxu3 }
 0x283   : > { %v825_v22 = vmax.f32 %v2741_v20, %v2743_v21 }
 0x285   : > { %826 = vmax.xlane.f32.xlu1 %v825_v22 }
 0x28a   : > { %v2747_v23 = vpop.f32.mrf.mxu2  ;;  %v2749_v24 = vpop.f32.mrf.mxu3 }
 0x28b   : > { %v828_v25 = vmax.f32 %v2747_v23, %v2749_v24 }
 0x28d   : > { %829 = vmax.xlane.f32.xlu0 %v828_v25 }
 0x28f   : > { %2220 = vmatmul.msk.bf16.gmra.mxu2 %vm513_vm1, %v568_v0  ;;  %2236 = vmatmul.msk.bf16.gmra.mxu3 %vm513_vm1, %v568_v0 }
 0x292   : > { %v2755_v26 = vpop.f32.mrf.mxu2  ;;  %v2757_v27 = vpop.f32.mrf.mxu3 }
 0x293   : > { %v831_v28 = vmax.f32 %v2755_v26, %v2757_v27 }
 0x295   : > { %832 = vmax.xlane.f32.xlu1 %v831_v28 }
 0x29a   : > { %v2761_v29 = vpop.f32.mrf.mxu2  ;;  %v2763_v30 = vpop.f32.mrf.mxu3 }
 0x29b   : > { %v834_v31 = vmax.f32 %v2761_v29, %v2763_v30 }
 0x29d   : > { %835 = vmax.xlane.f32.xlu0 %v834_v31 }
 0x29f   : > { %2221 = vmatmul.msk.bf16.gmra.mxu2 %vm513_vm1, %v570_v2  ;;  %2237 = vmatmul.msk.bf16.gmra.mxu3 %vm513_vm1, %v570_v2 }
 0x2a2   : > { %v2769_v32 = vpop.f32.mrf.mxu2  ;;  %v2771_v33 = vpop.f32.mrf.mxu3 }
 0x2aa   : > { %v2773_v34 = vpop.f32.mrf.mxu2  ;;  %v2775_v35 = vpop.f32.mrf.mxu3 }
 0x2af   : > { %2222 = vmatmul.msk.bf16.gmra.mxu2 %vm513_vm1, %v572_v4  ;;  %2238 = vmatmul.msk.bf16.gmra.mxu3 %vm513_vm1, %v572_v4 }
 0x2b2   : > { %v2779_v36 = vpop.f32.mrf.mxu2  ;;  %v2781_v37 = vpop.f32.mrf.mxu3 }
 0x2ba   : > { %v2783_v38 = vpop.f32.mrf.mxu2  ;;  %v2785_v39 = vpop.f32.mrf.mxu3 }
 0x2bf   : > { %2223 = vmatmul.msk.bf16.gmra.mxu2 %vm513_vm1, %v574_v6  ;;  %2239 = vmatmul.msk.bf16.gmra.mxu3 %vm513_vm1, %v574_v6 }
 0x2c2   : > { %v2789_v40 = vpop.f32.mrf.mxu2  ;;  %v2791_v41 = vpop.f32.mrf.mxu3 }
 0x2ca   : > { %v2793_v42 = vpop.f32.mrf.mxu2  ;;  %v2795_v43 = vpop.f32.mrf.mxu3 }
 0x2cf   : > { %2224 = vmatmul.msk.bf16.gmra.mxu2 %vm513_vm1, %v576_v44  ;;  %2240 = vmatmul.msk.bf16.gmra.mxu3 %vm513_vm1, %v576_v44 }
 0x2d2   : > { %v2799_v45 = vpop.f32.mrf.mxu2  ;;  %v2801_v46 = vpop.f32.mrf.mxu3 }
 0x2d8   : > { %v815_v47 = vpop.xlane.xlu2 %814 }
 0x2d9   : > { %v909_v48 = vsub.f32 %v2713_v8, %v815_v47  ;;  %v910_v49 = vsub.f32 %v2715_v9, %v815_v47 }
 0x2da   : > { %v2805_v50 = vpop.f32.mrf.mxu2  ;;  %v2807_v51 = vpop.f32.mrf.mxu3 }
 0x2db   : > { %v973_v52 = vpack.c.bf16 %v910_v49, %v909_v48 }
 0x2dd   : > { %v1005_v53 = vunpack.c.l.bf16 %v973_v52  ;;  %v1006_v54 = vunpack.c.h.bf16 %v973_v52 }
 0x2df   : > { %v1069_v55 = vmul.f32 1.442695, %v1005_v53  ;;  %v1071_v56 = vmul.f32 1.442695, %v1006_v54 }
 0x2e0   : > { %v818_v57 = vpop.xlane.xlu0 %817 }
 0x2e1   : > { %2377 = vpow2.f32 %v1069_v55  ;;  %v911_v58 = vsub.f32 %v2719_v11, %v818_v57  ;;  %v912_v59 = vsub.f32 %v2721_v12, %v818_v57 }
 0x2e2   : > { %2379 = vpow2.f32 %v1071_v56  ;;  %v2811_v60 = vpop.f32.mrf.mxu2  ;;  %v2813_v61 = vpop.f32.mrf.mxu3  ;;  %v837_v56 = vmax.f32 %v2769_v32, %v2771_v33 }
 0x2e3   : > { %v974_v62 = vpack.c.bf16 %v912_v59, %v911_v58 }
 0x2e5   : > { %v1007_v63 = vunpack.c.l.bf16 %v974_v62  ;;  %v1008_v0 = vunpack.c.h.bf16 %v974_v62 }
 0x2e7   : > { %v2378_v1 = vpop.eup %2377  ;;  %v1073_v2 = vmul.f32 1.442695, %v1007_v63  ;;  %v1075_v3 = vmul.f32 1.442695, %v1008_v0 }
 0x2e8   : > { %v2380_v4 = vpop.eup %2379  ;;  %v821_v5 = vpop.xlane.xlu1 %820 }
 0x2e9   : > { %2381 = vpow2.f32 %v1073_v2  ;;  %v913_v6 = vsub.f32 %v2727_v14, %v821_v5  ;;  %v914_v7 = vsub.f32 %v2729_v15, %v821_v5  ;;  %v2817_v8 = vpack.c.bf16 %v2380_v4, %v2378_v1 }
 0x2ea   : > { %2383 = vpow2.f32 %v1075_v3  ;;  %v2819_v9 = vpop.f32.mrf.mxu2  ;;  %v2821_v10 = vpop.f32.mrf.mxu3 }
 0x2eb   : > { %v975_v11 = vpack.c.bf16 %v914_v7, %v913_v6  ;;  %v3594_v12 = vunpack.c.l.bf16 %v2817_v8  ;;  %v3593_v13 = vunpack.c.h.bf16 %v2817_v8 }
 0x2ed   : > { %v1009_v16 = vunpack.c.l.bf16 %v975_v11  ;;  %v1010_v19 = vunpack.c.h.bf16 %v975_v11  ;;  %v1293_v14 = vadd.f32 %v3593_v13, %v3594_v12 }
 0x2ef   : > { %v2382_v15 = vpop.eup %2381  ;;  %v1077_v22 = vmul.f32 1.442695, %v1009_v16  ;;  %v1079_v25 = vmul.f32 1.442695, %v1010_v19  ;;  %1294 = vadd.xlane.f32.xlu1 %v1293_v14  ;;  %v840_v14 = vmax.f32 %v2773_v34, %v2775_v35 }
 0x2f0   : > { %v2384_v28 = vpop.eup %2383  ;;  %v824_v31 = vpop.xlane.xlu0 %823 }
 0x2f1   : > { %2385 = vpow2.f32 %v1077_v22  ;;  %v915_v44 = vsub.f32 %v2733_v17, %v824_v31  ;;  %v916_v47 = vsub.f32 %v2735_v18, %v824_v31  ;;  %v2831_v48 = vpack.c.bf16 %v2384_v28, %v2382_v15 }
 0x2f2   : > { %2387 = vpow2.f32 %v1079_v25  ;;  %v2833_v49 = vpop.f32.mrf.mxu2  ;;  %v2835_v52 = vpop.f32.mrf.mxu3 }
 0x2f3   : > { %v976_v53 = vpack.c.bf16 %v916_v47, %v915_v44  ;;  %v3592_v54 = vunpack.c.l.bf16 %v2831_v48  ;;  %v3591_v55 = vunpack.c.h.bf16 %v2831_v48 }
 0x2f5   : > { %v1011_v57 = vunpack.c.l.bf16 %v976_v53  ;;  %v1012_v58 = vunpack.c.h.bf16 %v976_v53  ;;  %v1296_v17 = vadd.f32 %v3591_v55, %v3592_v54  ;;  %v2340_v55 = vld [vmem:[%s2947_s19 + $0x48] sm:$0xff] }
 0x2f7   : > { %v2386_v18 = vpop.eup %2385  ;;  %v1081_v59 = vmul.f32 1.442695, %v1011_v57  ;;  %v1083_v62 = vmul.f32 1.442695, %v1012_v58  ;;  %1297 = vadd.xlane.f32.xlu0 %v1296_v17  ;;  %838 = vmax.xlane.f32.xlu1 %v837_v56 }
 0x2f8   : > { %v2388_v63 = vpop.eup %2387  ;;  %v827_v0 = vpop.xlane.xlu1 %826 }
 0x2f9   : > { %2389 = vpow2.f32 %v1081_v59  ;;  %v917_v1 = vsub.f32 %v2741_v20, %v827_v0  ;;  %v918_v2 = vsub.f32 %v2743_v21, %v827_v0  ;;  %v2847_v3 = vpack.c.bf16 %v2388_v63, %v2386_v18 }
 0x2fa   : > { %2391 = vpow2.f32 %v1083_v62  ;;  %v2849_v4 = vpop.f32.mrf.mxu2  ;;  %v2851_v5 = vpop.f32.mrf.mxu3  ;;  %v843_v18 = vmax.f32 %v2779_v36, %v2781_v37 }
 0x2fb   : > { %v977_v6 = vpack.c.bf16 %v918_v2, %v917_v1  ;;  %v3590_v7 = vunpack.c.l.bf16 %v2847_v3  ;;  %v3588_v11 = vunpack.c.h.bf16 %v2847_v3 }
 0x2fd   : > { %v1013_v16 = vunpack.c.l.bf16 %v977_v6  ;;  %v1014_v19 = vunpack.c.h.bf16 %v977_v6  ;;  %v1299_v20 = vadd.f32 %v3588_v11, %v3590_v7  ;;  %v2333_v11 = vld [vmem:[%s2947_s19 + $0x10] sm:$0xff]  ;;  %v2332_v7 = vld [vmem:[%s2947_s19 + $0x8] sm:$0xff] }
 0x2ff   : > { %v2390_v21 = vpop.eup %2389  ;;  %v1085_v15 = vmul.f32 1.442695, %v1013_v16  ;;  %v1087_v22 = vmul.f32 1.442695, %v1014_v19  ;;  %841 = vmax.xlane.f32.xlu0 %v840_v14  ;;  %1300 = vadd.xlane.f32.xlu1 %v1299_v20 }
 0x300   : > { %v2392_v25 = vpop.eup %2391  ;;  %v830_v28 = vpop.xlane.xlu0 %829 }
 0x301   : > { %2393 = vpow2.f32 %v1085_v15  ;;  %v919_v31 = vsub.f32 %v2747_v23, %v830_v28  ;;  %v920_v44 = vsub.f32 %v2749_v24, %v830_v28  ;;  %v2863_v47 = vpack.c.bf16 %v2392_v25, %v2390_v21 }
 0x302   : > { %2395 = vpow2.f32 %v1087_v22  ;;  %v2865_v53 = vpop.f32.mrf.mxu2  ;;  %v2867_v56 = vpop.f32.mrf.mxu3  ;;  %v846_v15 = vmax.f32 %v2783_v38, %v2785_v39 }
 0x303   : > { %v978_v57 = vpack.c.bf16 %v920_v44, %v919_v31  ;;  %v3589_v58 = vunpack.c.l.bf16 %v2863_v47  ;;  %v3587_v17 = vunpack.c.h.bf16 %v2863_v47 }
 0x305   : > { %v1015_v59 = vunpack.c.l.bf16 %v978_v57  ;;  %v1016_v62 = vunpack.c.h.bf16 %v978_v57  ;;  %v1302_v23 = vadd.f32 %v3587_v17, %v3589_v58  ;;  %v2342_v17 = vld [vmem:[%s2947_s19 + $0x58] sm:$0xff]  ;;  %v2341_v58 = vld [vmem:[%s2947_s19 + $0x50] sm:$0xff] }
 0x307   : > { %v2394_v24 = vpop.eup %2393  ;;  %v1089_v63 = vmul.f32 1.442695, %v1015_v59  ;;  %v1091_v0 = vmul.f32 1.442695, %v1016_v62  ;;  %1303 = vadd.xlane.f32.xlu0 %v1302_v23  ;;  %844 = vmax.xlane.f32.xlu1 %v843_v18 }
 0x308   : > { %v2396_v1 = vpop.eup %2395  ;;  %v833_v2 = vpop.xlane.xlu1 %832 }
 0x309   : > { %2397 = vpow2.f32 %v1089_v63  ;;  %v921_v6 = vsub.f32 %v2755_v26, %v833_v2  ;;  %v922_v16 = vsub.f32 %v2757_v27, %v833_v2  ;;  %v2879_v19 = vpack.c.bf16 %v2396_v1, %v2394_v24 }
 0x30a   : > { %2399 = vpow2.f32 %v1091_v0  ;;  %v2881_v14 = vpop.f32.mrf.mxu2  ;;  %v2883_v20 = vpop.f32.mrf.mxu3 }
 0x30b   : > { %v979_v21 = vpack.c.bf16 %v922_v16, %v921_v6  ;;  %v3586_v22 = vunpack.c.l.bf16 %v2879_v19  ;;  %v3584_v25 = vunpack.c.h.bf16 %v2879_v19  ;;  %v849_v16 = vmax.f32 %v2789_v40, %v2791_v41 }
 0x30d   : > { %v1017_v28 = vunpack.c.l.bf16 %v979_v21  ;;  %v1018_v31 = vunpack.c.h.bf16 %v979_v21  ;;  %v1305_v26 = vadd.f32 %v3584_v25, %v3586_v22  ;;  %v2336_v25 = vld [vmem:[%s2947_s19 + $0x28] sm:$0xff] }
 0x30f   : > { %v2398_v27 = vpop.eup %2397  ;;  %v1093_v44 = vmul.f32 1.442695, %v1017_v28  ;;  %v1095_v57 = vmul.f32 1.442695, %v1018_v31  ;;  %847 = vmax.xlane.f32.xlu0 %v846_v15  ;;  %1306 = vadd.xlane.f32.xlu1 %v1305_v26 }
 0x310   : > { %v2400_v18 = vpop.eup %2399  ;;  %v836_v59 = vpop.xlane.xlu0 %835 }
 0x311   : > { %2401 = vpow2.f32 %v1093_v44  ;;  %v923_v62 = vsub.f32 %v2761_v29, %v836_v59  ;;  %v924_v23 = vsub.f32 %v2763_v30, %v836_v59  ;;  %v2895_v24 = vpack.c.bf16 %v2400_v18, %v2398_v27 }
 0x312   : > { %2403 = vpow2.f32 %v1095_v57  ;;  %v2897_v63 = vpop.f32.mrf.mxu2  ;;  %v2899_v0 = vpop.f32.mrf.mxu3  ;;  %v852_v18 = vmax.f32 %v2793_v42, %v2795_v43 }
 0x313   : > { %v980_v1 = vpack.c.bf16 %v924_v23, %v923_v62  ;;  %v3585_v2 = vunpack.c.l.bf16 %v2895_v24  ;;  %v3583_v6 = vunpack.c.h.bf16 %v2895_v24 }
 0x315   : > { %v1019_v21 = vunpack.c.l.bf16 %v980_v1  ;;  %v1020_v15 = vunpack.c.h.bf16 %v980_v1  ;;  %v1308_v29 = vadd.f32 %v3583_v6, %v3585_v2  ;;  %v2345_v6 = vld [vmem:[%s2947_s19 + $0x70] sm:$0xff] }
 0x317   : > { %v2402_v30 = vpop.eup %2401  ;;  %v1097_v28 = vmul.f32 1.442695, %v1019_v21  ;;  %v1099_v31 = vmul.f32 1.442695, %v1020_v15  ;;  %1309 = vadd.xlane.f32.xlu0 %v1308_v29  ;;  %850 = vmax.xlane.f32.xlu1 %v849_v16 }
 0x318   : > { %v2404_v26 = vpop.eup %2403 }
 0x319   : > { %2405 = vpow2.f32 %v1097_v28  ;;  %v2909_v27 = vpack.c.bf16 %v2404_v26, %v2402_v30 }
 0x31a   : > { %2407 = vpow2.f32 %v1099_v31  ;;  %v2911_v44 = vpop.f32.mrf.mxu2  ;;  %v2913_v57 = vpop.f32.mrf.mxu3  ;;  %v855_v31 = vmax.f32 %v2799_v45, %v2801_v46 }
 0x31b   : > { %v3582_v59 = vunpack.c.l.bf16 %v2909_v27  ;;  %v3580_v62 = vunpack.c.h.bf16 %v2909_v27 }
 0x31d   : > { %v1311_v23 = vadd.f32 %v3580_v62, %v3582_v59  ;;  %v2337_v59 = vld [vmem:[%s2947_s19 + $0x30] sm:$0xff] }
 0x31f   : > { %v2406_v1 = vpop.eup %2405  ;;  %853 = vmax.xlane.f32.xlu0 %v852_v18  ;;  %1312 = vadd.xlane.f32.xlu1 %v1311_v23 }
 0x320   : > { %v2408_v16 = vpop.eup %2407 }
 0x321   : > { %v2923_v21 = vpack.c.bf16 %v2408_v16, %v2406_v1  ;;  %v858_v1 = vmax.f32 %v2805_v50, %v2807_v51 }
 0x322   : > { %v2925_v15 = vpop.f32.mrf.mxu2  ;;  %v2927_v29 = vpop.f32.mrf.mxu3 }
 0x323   : > { %v3581_v30 = vunpack.c.l.bf16 %v2923_v21  ;;  %v3579_v28 = vunpack.c.h.bf16 %v2923_v21 }
 0x325   : > { %v1314_v26 = vadd.f32 %v3579_v28, %v3581_v30  ;;  %v2346_v28 = vld [vmem:[%s2947_s19 + $0x78] sm:$0xff] }
 0x326   : > { %1798 = vmatpush.bf16.msrb.mxu1 %v2346_v28 }
 0x327   : > { %1315 = vadd.xlane.f32.xlu0 %v1314_v26  ;;  %856 = vmax.xlane.f32.xlu1 %v855_v31  ;;  %v2338_v26 = vld [vmem:[%s2947_s19 + $0x38] sm:$0xff] }
 0x328   : > { %1709 = vmatpush.bf16.msrb.mxu0 %v2338_v26  ;;  %v2344_v26 = vld [vmem:[%s2947_s19 + $0x68] sm:$0xff] }
 0x32a   : > { %v2937_v18 = vpop.f32.mrf.mxu2  ;;  %v2939_v23 = vpop.f32.mrf.mxu3  ;;  %1799 = vmatpush.bf16.msrb.mxu1 %v2345_v6  ;;  %v2343_v6 = vld [vmem:[%s2947_s19 + $0x60] sm:$0xff] }
 0x32c   : > { %1710 = vmatpush.bf16.msrb.mxu0 %v2337_v59  ;;  %v2335_v59 = vld [vmem:[%s2947_s19 + $0x20] sm:$0xff] }
 0x32e   : > { %1800 = vmatpush.bf16.msrb.mxu1 %v2344_v26 }
 0x32f   : > { %859 = vmax.xlane.f32.xlu0 %v858_v1 }
 0x330   : > { %1711 = vmatpush.bf16.msrb.mxu0 %v2336_v25  ;;  %v2331_v25 = vld [vmem:[%s2947_s19] sm:$0xff] }
 0x332   : > { %v2949_v16 = vpop.f32.mrf.mxu2  ;;  %v2951_v31 = vpop.f32.mrf.mxu3  ;;  %1801 = vmatpush.bf16.msrb.mxu1 %v2343_v6 }
 0x334   : > { %1712 = vmatpush.bf16.msrb.mxu0 %v2335_v59 }
 0x336   : > { %1802 = vmatpush.bf16.msrb.mxu1 %v2342_v17 }
 0x33a   : > { %v2955_v62 = vpop.f32.mrf.mxu2  ;;  %v2957_v30 = vpop.f32.mrf.mxu3  ;;  %1803 = vmatpush.bf16.msrb.mxu1 %v2341_v58 }
 0x33b   : > { %3611 = vst [vmem:[#allocation2_spill] sm:$0xff] %v2955_v62  ;;  %v894_v1 = vmax.f32 %v2955_v62, %v2957_v30 }
 0x33c   : > { %3612 = vst [vmem:[#allocation3_spill] sm:$0xff] %v2957_v30 }
 0x33d   : > { %895 = vmax.xlane.f32.xlu2 %v894_v1  ;;  %v2334_v1 = vld [vmem:[%s2947_s19 + $0x18] sm:$0xff] }
 0x33e   : > { %1713 = vmatpush.bf16.msrb.mxu0 %v2334_v1  ;;  %1804 = vmatpush.bf16.msrb.mxu1 %v2340_v55 }
 0x342   : > { %v2965_v28 = vpop.f32.mrf.mxu2  ;;  %v2967_v2 = vpop.f32.mrf.mxu3  ;;  %1714 = vmatpush.bf16.msrb.mxu0 %v2333_v11 }
 0x343   : > { %3613 = vst [vmem:[#allocation4_spill] sm:$0xff] %v2965_v28  ;;  %v897_v22 = vmax.f32 %v2965_v28, %v2967_v2 }
 0x344   : > { %3614 = vst [vmem:[#allocation5_spill] sm:$0xff] %v2967_v2 }
 0x345   : > { %898 = vmax.xlane.f32.xlu2 %v897_v22  ;;  %v2339_v22 = vld [vmem:[%s2947_s19 + $0x40] sm:$0xff] }
 0x346   : > { %1715 = vmatpush.bf16.msrb.mxu0 %v2332_v7  ;;  %1805 = vmatpush.bf16.msrb.mxu1 %v2339_v22 }
 0x34a   : > { %1716 = vmatpush.bf16.msrb.mxu0 %v2331_v25 }
 0x362   : > { %v1295_v26 = vpop.xlane.xlu1 %1294 }
 0x363   : > { %2409 = vrcp.f32 %v1295_v26 }
 0x369   : > { %v2410_v54 = vpop.eup %2409 }
 0x36a   : > { %v1298_v59 = vpop.xlane.xlu0 %1297  ;;  %v839_v6 = vpop.xlane.xlu1 %838  ;;  %v1421_v58 = vpack.c.bf16 %v2410_v54, %v2410_v54 }
 0x36b   : > { %2411 = vrcp.f32 %v1298_v59  ;;  %v925_v17 = vsub.f32 %v2769_v32, %v839_v6  ;;  %v926_v1 = vsub.f32 %v2771_v33, %v839_v6  ;;  %v3615_v33 = vunpack.c.l.bf16 %v2817_v8 }
 0x36c   : > { %v1453_v28 = vunpack.c.l.bf16 %v1421_v58  ;;  %v3616_v6 = vunpack.c.h.bf16 %v2817_v8 }
 0x36d   : > { %v981_v11 = vpack.c.bf16 %v926_v1, %v925_v17  ;;  %v3618_v1 = vunpack.c.h.bf16 %v2831_v48 }
 0x36e   : > { %v1485_v54 = vmul.f32 %v1453_v28, %v3615_v33  ;;  %v1486_v17 = vmul.f32 %v1453_v28, %v3616_v6 }
 0x36f   : > { %v1021_v13 = vunpack.c.l.bf16 %v981_v11  ;;  %v1022_v12 = vunpack.c.h.bf16 %v981_v11 }
 0x371   : > { %v2412_v7 = vpop.eup %2411  ;;  %v1101_v55 = vmul.f32 1.442695, %v1021_v13  ;;  %v1103_v2 = vmul.f32 1.442695, %v1022_v12  ;;  %v3617_v12 = vunpack.c.l.bf16 %v2831_v48 }
 0x372   : > { %v1422_v25 = vpack.c.bf16 %v2412_v7, %v2412_v7  ;;  %v842_v22 = vpop.xlane.xlu0 %841  ;;  %v1301_v30 = vpop.xlane.xlu1 %1300 }
 0x373   : > { %2413 = vpow2.f32 %v1101_v55  ;;  %v927_v26 = vsub.f32 %v2773_v34, %v842_v22  ;;  %v928_v59 = vsub.f32 %v2775_v35, %v842_v22 }
 0x374   : > { %v1454_v62 = vunpack.c.l.bf16 %v1422_v25  ;;  %2415 = vpow2.f32 %v1103_v2 }
 0x375   : > { %v982_v32 = vpack.c.bf16 %v928_v59, %v927_v26  ;;  %2417 = vrcp.f32 %v1301_v30 }
 0x376   : > { %v1487_v13 = vmul.f32 %v1454_v62, %v3617_v12  ;;  %v1488_v11 = vmul.f32 %v1454_v62, %v3618_v1 }
 0x377   : > { %v1023_v58 = vunpack.c.l.bf16 %v982_v32  ;;  %v1024_v7 = vunpack.c.h.bf16 %v982_v32 }
 0x378   : > { %v1549_v34 = vpack.c.bf16 %v1487_v13, %v1485_v54  ;;  %v1550_v35 = vpack.c.bf16 %v1488_v11, %v1486_v17 }
 0x379   : > { %v2414_v55 = vpop.eup %2413  ;;  %v1105_v2 = vmul.f32 1.442695, %v1023_v58  ;;  %v1107_v25 = vmul.f32 1.442695, %v1024_v7 }
 0x37a   : > { %v2416_v22 = vpop.eup %2415  ;;  %v1304_v26 = vpop.xlane.xlu0 %1303  ;;  %1717 = vmatmul.bf16.vlgmr.msrb.gmra.mxu0 %v1549_v34  ;;  %1806 = vmatmul.bf16.vlgmr.msrb.gmra.mxu1 %v1550_v35 }
 0x37b   : > { %v845_v8 = vpop.xlane.xlu1 %844  ;;  %2419 = vpow2.f32 %v1105_v2  ;;  %v2995_v48 = vpack.c.bf16 %v2416_v22, %v2414_v55  ;;  %v2418_v62 = vpop.eup %2417 }
 0x37c   : > { %v929_v28 = vsub.f32 %v2779_v36, %v845_v8  ;;  %v930_v59 = vsub.f32 %v2781_v37, %v845_v8  ;;  %2421 = vpow2.f32 %v1107_v25  ;;  %v1423_v36 = vpack.c.bf16 %v2418_v62, %v2418_v62 }
 0x37d   : > { %2423 = vrcp.f32 %v1304_v26  ;;  %v1245_v32 = vunpack.c.l.bf16 %v2995_v48  ;;  %v1246_v33 = vunpack.c.h.bf16 %v2995_v48 }
 0x37e   : > { %v983_v30 = vpack.c.bf16 %v930_v59, %v929_v28  ;;  %v1455_v2 = vunpack.c.l.bf16 %v1423_v36  ;;  %v861_v59 = vmax.f32 %v2811_v60, %v2813_v61  ;;  %v3621_v36 = vunpack.c.h.bf16 %v2847_v3 }
 0x37f   : > { %v1317_v17 = vadd.f32 %v1246_v33, %v1245_v32 }
 0x380   : > { %v1025_v54 = vunpack.c.l.bf16 %v983_v30  ;;  %v1026_v6 = vunpack.c.h.bf16 %v983_v30 }
 0x381   : > { %v2420_v12 = vpop.eup %2419  ;;  %1318 = vadd.xlane.f32.xlu1 %v1317_v17 }
 0x382   : > { %v1109_v37 = vmul.f32 1.442695, %v1025_v54  ;;  %v1111_v13 = vmul.f32 1.442695, %v1026_v6  ;;  %v2422_v1 = vpop.eup %2421  ;;  %v848_v11 = vpop.xlane.xlu0 %847  ;;  %v3620_v6 = vunpack.c.l.bf16 %v2863_v47 }
 0x383   : > { %v1307_v58 = vpop.xlane.xlu1 %1306  ;;  %v2424_v7 = vpop.eup %2423  ;;  %v931_v34 = vsub.f32 %v2783_v38, %v848_v11  ;;  %v932_v35 = vsub.f32 %v2785_v39, %v848_v11  ;;  %v3005_v55 = vpack.c.bf16 %v2422_v1, %v2420_v12  ;;  %v3619_v39 = vunpack.c.l.bf16 %v2847_v3 }
 0x384   : > { %2425 = vpow2.f32 %v1109_v37  ;;  %v1424_v25 = vpack.c.bf16 %v2424_v7, %v2424_v7  ;;  %v1490_v12 = vmul.f32 %v1455_v2, %v3621_v36  ;;  %v3622_v37 = vunpack.c.h.bf16 %v2863_v47 }
 0x385   : > { %2427 = vpow2.f32 %v1111_v13  ;;  %v984_v22 = vpack.c.bf16 %v932_v35, %v931_v34  ;;  %v1247_v26 = vunpack.c.l.bf16 %v3005_v55  ;;  %v1248_v8 = vunpack.c.h.bf16 %v3005_v55 }
 0x386   : > { %v1456_v28 = vunpack.c.l.bf16 %v1424_v25  ;;  %2429 = vrcp.f32 %v1307_v58  ;;  %v1489_v54 = vmul.f32 %v1455_v2, %v3619_v39 }
 0x387   : > { %v1027_v62 = vunpack.c.l.bf16 %v984_v22  ;;  %v1028_v30 = vunpack.c.h.bf16 %v984_v22  ;;  %v1320_v38 = vadd.f32 %v1248_v8, %v1247_v26 }
 0x388   : > { %v1491_v17 = vmul.f32 %v1456_v28, %v3620_v6  ;;  %v1492_v13 = vmul.f32 %v1456_v28, %v3622_v37 }
 0x389   : > { %v1113_v11 = vmul.f32 1.442695, %v1027_v62  ;;  %v1115_v58 = vmul.f32 1.442695, %v1028_v30  ;;  %1321 = vadd.xlane.f32.xlu0 %v1320_v38  ;;  %862 = vmax.xlane.f32.xlu1 %v861_v59  ;;  %v864_v38 = vmax.f32 %v2819_v9, %v2821_v10 }
 0x38a   : > { %v2426_v1 = vpop.eup %2425  ;;  %v1310_v34 = vpop.xlane.xlu0 %1309  ;;  %v1551_v35 = vpack.c.bf16 %v1491_v17, %v1489_v54  ;;  %v1552_v25 = vpack.c.bf16 %v1492_v13, %v1490_v12 }
 0x38b   : > { %v2428_v7 = vpop.eup %2427  ;;  %v851_v22 = vpop.xlane.xlu1 %850  ;;  %2431 = vpow2.f32 %v1113_v11 }
 0x38c   : > { %v933_v39 = vsub.f32 %v2789_v40, %v851_v22  ;;  %v934_v6 = vsub.f32 %v2791_v41, %v851_v22  ;;  %v3025_v3 = vpack.c.bf16 %v2428_v7, %v2426_v1  ;;  %2433 = vpow2.f32 %v1115_v58  ;;  %1722 = vmatmul.bf16.gmra.mxu0 %v1551_v35  ;;  %1811 = vmatmul.bf16.gmra.mxu1 %v1552_v25  ;;  %v2430_v47 = vpop.eup %2429 }
 0x38d   : > { %2435 = vrcp.f32 %v1310_v34  ;;  %v1425_v41 = vpack.c.bf16 %v2430_v47, %v2430_v47  ;;  %v867_v47 = vmax.f32 %v2833_v49, %v2835_v52 }
 0x38e   : > { %v985_v2 = vpack.c.bf16 %v934_v6, %v933_v39  ;;  %v1249_v28 = vunpack.c.l.bf16 %v3025_v3  ;;  %v1250_v59 = vunpack.c.h.bf16 %v3025_v3 }
 0x38f   : > { %v1457_v34 = vunpack.c.l.bf16 %v1425_v41  ;;  %v3625_v41 = vunpack.c.h.bf16 %v2879_v19 }
 0x390   : > { %v1029_v62 = vunpack.c.l.bf16 %v985_v2  ;;  %v1030_v30 = vunpack.c.h.bf16 %v985_v2  ;;  %v1323_v40 = vadd.f32 %v1250_v59, %v1249_v28 }
 0x391   : > { %v2432_v54 = vpop.eup %2431  ;;  %865 = vmax.xlane.f32.xlu0 %v864_v38  ;;  %v3624_v38 = vunpack.c.l.bf16 %v2895_v24 }
 0x392   : > { %v1117_v17 = vmul.f32 1.442695, %v1029_v62  ;;  %v1119_v36 = vmul.f32 1.442695, %v1030_v30  ;;  %1324 = vadd.xlane.f32.xlu1 %v1323_v40  ;;  %v2434_v12 = vpop.eup %2433  ;;  %v854_v37 = vpop.xlane.xlu0 %853 }
 0x393   : > { %v1313_v13 = vpop.xlane.xlu1 %1312  ;;  %v2436_v1 = vpop.eup %2435  ;;  %v935_v11 = vsub.f32 %v2793_v42, %v854_v37  ;;  %v936_v58 = vsub.f32 %v2795_v43, %v854_v37  ;;  %v3037_v7 = vpack.c.bf16 %v2434_v12, %v2432_v54  ;;  %v3623_v43 = vunpack.c.l.bf16 %v2879_v19 }
 0x394   : > { %2437 = vpow2.f32 %v1117_v17  ;;  %v1426_v35 = vpack.c.bf16 %v2436_v1, %v2436_v1  ;;  %v1494_v54 = vmul.f32 %v1457_v34, %v3625_v41  ;;  %v3626_v17 = vunpack.c.h.bf16 %v2895_v24 }
 0x395   : > { %2439 = vpow2.f32 %v1119_v36  ;;  %v986_v25 = vpack.c.bf16 %v936_v58, %v935_v11  ;;  %v1251_v22 = vunpack.c.l.bf16 %v3037_v7  ;;  %v1252_v39 = vunpack.c.h.bf16 %v3037_v7 }
 0x396   : > { %v1458_v6 = vunpack.c.l.bf16 %v1426_v35  ;;  %2441 = vrcp.f32 %v1313_v13  ;;  %v1493_v30 = vmul.f32 %v1457_v34, %v3623_v43 }
 0x397   : > { %v1031_v2 = vunpack.c.l.bf16 %v986_v25  ;;  %v1032_v62 = vunpack.c.h.bf16 %v986_v25  ;;  %v1326_v42 = vadd.f32 %v1252_v39, %v1251_v22 }
 0x398   : > { %v1495_v40 = vmul.f32 %v1458_v6, %v3624_v38  ;;  %v1496_v36 = vmul.f32 %v1458_v6, %v3626_v17 }
 0x399   : > { %v1121_v37 = vmul.f32 1.442695, %v1031_v2  ;;  %v1123_v13 = vmul.f32 1.442695, %v1032_v62  ;;  %1327 = vadd.xlane.f32.xlu0 %v1326_v42  ;;  %v870_v42 = vmax.f32 %v2849_v4, %v2851_v5 }
 0x39a   : > { %v2438_v12 = vpop.eup %2437  ;;  %868 = vmax.xlane.f32.xlu1 %v867_v47  ;;  %v1316_v11 = vpop.xlane.xlu0 %1315  ;;  %v1553_v58 = vpack.c.bf16 %v1495_v40, %v1493_v30  ;;  %v1554_v35 = vpack.c.bf16 %v1496_v36, %v1494_v54 }
 0x39b   : > { %v2440_v1 = vpop.eup %2439  ;;  %v857_v25 = vpop.xlane.xlu1 %856  ;;  %2443 = vpow2.f32 %v1121_v37 }
 0x39c   : > { %v937_v43 = vsub.f32 %v2799_v45, %v857_v25  ;;  %v938_v38 = vsub.f32 %v2801_v46, %v857_v25  ;;  %v3057_v19 = vpack.c.bf16 %v2440_v1, %v2438_v12  ;;  %2445 = vpow2.f32 %v1123_v13  ;;  %1727 = vmatmul.bf16.gmra.mxu0 %v1553_v58  ;;  %1816 = vmatmul.bf16.gmra.mxu1 %v1554_v35  ;;  %v2442_v24 = vpop.eup %2441 }
 0x39d   : > { %2447 = vrcp.f32 %v1316_v11  ;;  %v1427_v46 = vpack.c.bf16 %v2442_v24, %v2442_v24 }
 0x39e   : > { %v987_v34 = vpack.c.bf16 %v938_v38, %v937_v43  ;;  %v1253_v6 = vunpack.c.l.bf16 %v3057_v19  ;;  %v1254_v47 = vunpack.c.h.bf16 %v3057_v19 }
 0x39f   : > { %v1459_v1 = vunpack.c.l.bf16 %v1427_v46 }
 0x3a0   : > { %v1033_v2 = vunpack.c.l.bf16 %v987_v34  ;;  %v1034_v62 = vunpack.c.h.bf16 %v987_v34  ;;  %v1329_v45 = vadd.f32 %v1254_v47, %v1253_v6  ;;  %v3627_v34 = vunpack.c.l.bf16 %v2909_v27 }
 0x3a1   : > { %v2444_v30 = vpop.eup %2443  ;;  %871 = vmax.xlane.f32.xlu0 %v870_v42 }
 0x3a2   : > { %v1125_v40 = vmul.f32 1.442695, %v1033_v2  ;;  %v1127_v41 = vmul.f32 1.442695, %v1034_v62  ;;  %1330 = vadd.xlane.f32.xlu1 %v1329_v45  ;;  %v2446_v54 = vpop.eup %2445  ;;  %v860_v17 = vpop.xlane.xlu0 %859  ;;  %v1497_v2 = vmul.f32 %v1459_v1, %v3627_v34  ;;  %v3628_v62 = vunpack.c.l.bf16 %v2923_v21 }
 0x3a3   : > { %v2448_v36 = vpop.eup %2447  ;;  %v939_v12 = vsub.f32 %v2805_v50, %v860_v17  ;;  %v940_v37 = vsub.f32 %v2807_v51, %v860_v17  ;;  %v3069_v13 = vpack.c.bf16 %v2446_v54, %v2444_v30  ;;  %v873_v51 = vmax.f32 %v2865_v53, %v2867_v56 }
 0x3a4   : > { %2449 = vpow2.f32 %v1125_v40  ;;  %v1428_v11 = vpack.c.bf16 %v2448_v36, %v2448_v36  ;;  %v3629_v45 = vunpack.c.h.bf16 %v2909_v27  ;;  %v3630_v30 = vunpack.c.h.bf16 %v2923_v21 }
 0x3a5   : > { %2451 = vpow2.f32 %v1127_v41  ;;  %v988_v58 = vpack.c.bf16 %v940_v37, %v939_v12  ;;  %v1255_v35 = vunpack.c.l.bf16 %v3069_v13  ;;  %v1256_v25 = vunpack.c.h.bf16 %v3069_v13 }
 0x3a6   : > { %v1460_v43 = vunpack.c.l.bf16 %v1428_v11  ;;  %v1498_v46 = vmul.f32 %v1459_v1, %v3629_v45  ;;  %v876_v21 = vmax.f32 %v2881_v14, %v2883_v20 }
 0x3a7   : > { %v1035_v38 = vunpack.c.l.bf16 %v988_v58  ;;  %v1036_v24 = vunpack.c.h.bf16 %v988_v58  ;;  %v1332_v50 = vadd.f32 %v1256_v25, %v1255_v35 }
 0x3a8   : > { %v1499_v42 = vmul.f32 %v1460_v43, %v3628_v62  ;;  %v1500_v40 = vmul.f32 %v1460_v43, %v3630_v30  ;;  %v882_v62 = vmax.f32 %v2911_v44, %v2913_v57 }
 0x3a9   : > { %v1129_v54 = vmul.f32 1.442695, %v1035_v38  ;;  %v1131_v17 = vmul.f32 1.442695, %v1036_v24  ;;  %1333 = vadd.xlane.f32.xlu0 %v1332_v50 }
 0x3aa   : > { %v2450_v41 = vpop.eup %2449  ;;  %874 = vmax.xlane.f32.xlu1 %v873_v51  ;;  %v1555_v12 = vpack.c.bf16 %v1499_v42, %v1497_v2  ;;  %v1556_v37 = vpack.c.bf16 %v1500_v40, %v1498_v46  ;;  %v879_v2 = vmax.f32 %v2897_v63, %v2899_v0 }
 0x3ab   : > { %v2452_v36 = vpop.eup %2451  ;;  %2453 = vpow2.f32 %v1129_v54 }
 0x3ac   : > { %v3087_v11 = vpack.c.bf16 %v2452_v36, %v2450_v41  ;;  %2455 = vpow2.f32 %v1131_v17  ;;  %1732 = vmatmul.bf16.gmra.mxu0 %v1555_v12  ;;  %1821 = vmatmul.bf16.gmra.mxu1 %v1556_v37 }
 0x3ae   : > { %v1257_v27 = vunpack.c.l.bf16 %v3087_v11  ;;  %v1258_v1 = vunpack.c.h.bf16 %v3087_v11 }
 0x3b0   : > { %v1335_v58 = vadd.f32 %v1258_v1, %v1257_v27 }
 0x3b1   : > { %v2454_v43 = vpop.eup %2453  ;;  %877 = vmax.xlane.f32.xlu0 %v876_v21 }
 0x3b2   : > { %1336 = vadd.xlane.f32.xlu1 %v1335_v58  ;;  %v2456_v38 = vpop.eup %2455 }
 0x3b3   : > { %v3097_v24 = vpack.c.bf16 %v2456_v38, %v2454_v43 }
 0x3b5   : > { %v1259_v50 = vunpack.c.l.bf16 %v3097_v24  ;;  %v3599_v51 = vunpack.c.h.bf16 %v3097_v24 }
 0x3b7   : > { %v1338_v34 = vadd.f32 %v3599_v51, %v1259_v50 }
 0x3b9   : > { %1339 = vadd.xlane.f32.xlu0 %v1338_v34 }
 0x3ba   : > { %880 = vmax.xlane.f32.xlu1 %v879_v2 }
 0x3c1   : > { %883 = vmax.xlane.f32.xlu0 %v882_v62 }
 0x3f4   : > { %v1319_v42 = vpop.xlane.xlu1 %1318 }
 0x3f5   : > { %2457 = vrcp.f32 %v1319_v42 }
 0x3f7   : > { %v1718_v45 = vpop.f32.mrf.mxu0  ;;  %v1807_v46 = vpop.f32.mrf.mxu1 }
 0x3f8   : > { %v3109_v30 = vadd.f32 %v1807_v46, %v1718_v45 }
 0x3fb   : > { %v2458_v54 = vpop.eup %2457 }
 0x3fc   : > { %v1322_v40 = vpop.xlane.xlu0 %1321  ;;  %v863_v41 = vpop.xlane.xlu1 %862  ;;  %v1429_v58 = vpack.c.bf16 %v2458_v54, %v2458_v54 }
 0x3fd   : > { %2459 = vrcp.f32 %v1322_v40  ;;  %v941_v17 = vsub.f32 %v2811_v60, %v863_v41  ;;  %v942_v36 = vsub.f32 %v2813_v61, %v863_v41 }
 0x3fe   : > { %v1461_v42 = vunpack.c.l.bf16 %v1429_v58 }
 0x3ff   : > { %v989_v12 = vpack.c.bf16 %v942_v36, %v941_v17  ;;  %v3113_v37 = vpop.f32.mrf.mxu0  ;;  %v3115_v21 = vpop.f32.mrf.mxu1 }
 0x400   : > { %v1501_v54 = vmul.f32 %v1461_v42, %v1245_v32  ;;  %v1502_v36 = vmul.f32 %v1461_v42, %v1246_v33 }
 0x401   : > { %v1037_v43 = vunpack.c.l.bf16 %v989_v12  ;;  %v1038_v38 = vunpack.c.h.bf16 %v989_v12 }
 0x403   : > { %v2460_v34 = vpop.eup %2459  ;;  %v1133_v2 = vmul.f32 1.442695, %v1037_v43  ;;  %v1135_v62 = vmul.f32 1.442695, %v1038_v38 }
 0x404   : > { %v1430_v45 = vpack.c.bf16 %v2460_v34, %v2460_v34  ;;  %v866_v46 = vpop.xlane.xlu0 %865 }
 0x405   : > { %v1325_v51 = vpop.xlane.xlu1 %1324  ;;  %2461 = vpow2.f32 %v1133_v2  ;;  %v943_v60 = vsub.f32 %v2819_v9, %v866_v46  ;;  %v944_v61 = vsub.f32 %v2821_v10, %v866_v46 }
 0x406   : > { %v1462_v40 = vunpack.c.l.bf16 %v1430_v45  ;;  %2463 = vpow2.f32 %v1135_v62 }
 0x407   : > { %v990_v41 = vpack.c.bf16 %v944_v61, %v943_v60  ;;  %2465 = vrcp.f32 %v1325_v51 }
 0x408   : > { %v1503_v17 = vmul.f32 %v1462_v40, %v1247_v26  ;;  %v1504_v12 = vmul.f32 %v1462_v40, %v1248_v8 }
 0x409   : > { %v1039_v58 = vunpack.c.l.bf16 %v990_v41  ;;  %v1040_v9 = vunpack.c.h.bf16 %v990_v41  ;;  %v1723_v43 = vpop.f32.mrf.mxu0  ;;  %v1812_v10 = vpop.f32.mrf.mxu1 }
 0x40a   : > { %v3127_v38 = vadd.f32 %v1812_v10, %v1723_v43  ;;  %v1557_v34 = vpack.c.bf16 %v1503_v17, %v1501_v54  ;;  %v1558_v51 = vpack.c.bf16 %v1504_v12, %v1502_v36 }
 0x40b   : > { %v2462_v2 = vpop.eup %2461  ;;  %v1137_v62 = vmul.f32 1.442695, %v1039_v58  ;;  %v1139_v32 = vmul.f32 1.442695, %v1040_v9 }
 0x40c   : > { %v2464_v45 = vpop.eup %2463  ;;  %v1328_v46 = vpop.xlane.xlu0 %1327  ;;  %1737 = vmatmul.bf16.gmra.mxu0 %v1557_v34  ;;  %1826 = vmatmul.bf16.gmra.mxu1 %v1558_v51 }
 0x40d   : > { %v869_v48 = vpop.xlane.xlu1 %868  ;;  %v2466_v33 = vpop.eup %2465  ;;  %2467 = vpow2.f32 %v1137_v62  ;;  %v3131_v8 = vpack.c.bf16 %v2464_v45, %v2462_v2 }
 0x40e   : > { %v945_v55 = vsub.f32 %v2833_v49, %v869_v48  ;;  %v946_v26 = vsub.f32 %v2835_v52, %v869_v48  ;;  %2469 = vpow2.f32 %v1139_v32  ;;  %v1431_v40 = vpack.c.bf16 %v2466_v33, %v2466_v33 }
 0x40f   : > { %2471 = vrcp.f32 %v1328_v46  ;;  %v1261_v60 = vunpack.c.l.bf16 %v3131_v8  ;;  %v1262_v61 = vunpack.c.h.bf16 %v3131_v8 }
 0x410   : > { %v991_v42 = vpack.c.bf16 %v946_v26, %v945_v55  ;;  %v1463_v43 = vunpack.c.l.bf16 %v1431_v40  ;;  %v885_v26 = vmax.f32 %v2925_v15, %v2927_v29 }
 0x411   : > { %v3135_v17 = vpop.f32.mrf.mxu0  ;;  %v3137_v36 = vpop.f32.mrf.mxu1  ;;  %v1341_v49 = vadd.f32 %v1262_v61, %v1261_v60 }
 0x412   : > { %v1041_v41 = vunpack.c.l.bf16 %v991_v42  ;;  %v1042_v54 = vunpack.c.h.bf16 %v991_v42 }
 0x413   : > { %v2468_v52 = vpop.eup %2467  ;;  %1342 = vadd.xlane.f32.xlu1 %v1341_v49 }
 0x414   : > { %v1141_v12 = vmul.f32 1.442695, %v1041_v41  ;;  %v1143_v58 = vmul.f32 1.442695, %v1042_v54  ;;  %v2470_v9 = vpop.eup %2469  ;;  %v872_v10 = vpop.xlane.xlu0 %871  ;;  %v1505_v54 = vmul.f32 %v1463_v43, %v1249_v28 }
 0x415   : > { %v1331_v34 = vpop.xlane.xlu1 %1330  ;;  %v2472_v51 = vpop.eup %2471  ;;  %v947_v2 = vsub.f32 %v2849_v4, %v872_v10  ;;  %v948_v62 = vsub.f32 %v2851_v5, %v872_v10  ;;  %v3145_v32 = vpack.c.bf16 %v2470_v9, %v2468_v52 }
 0x416   : > { %2473 = vpow2.f32 %v1141_v12  ;;  %v1432_v45 = vpack.c.bf16 %v2472_v51, %v2472_v51  ;;  %v1506_v12 = vmul.f32 %v1463_v43, %v1250_v59 }
 0x417   : > { %2475 = vpow2.f32 %v1143_v58  ;;  %v992_v46 = vpack.c.bf16 %v948_v62, %v947_v2  ;;  %v1263_v48 = vunpack.c.l.bf16 %v3145_v32  ;;  %v1264_v33 = vunpack.c.h.bf16 %v3145_v32 }
 0x418   : > { %2477 = vrcp.f32 %v1331_v34  ;;  %v1464_v55 = vunpack.c.l.bf16 %v1432_v45 }
 0x419   : > { %v1043_v42 = vunpack.c.l.bf16 %v992_v46  ;;  %v1044_v40 = vunpack.c.h.bf16 %v992_v46  ;;  %v1728_v41 = vpop.f32.mrf.mxu0  ;;  %v1817_v4 = vpop.f32.mrf.mxu1  ;;  %v1344_v5 = vadd.f32 %v1264_v33, %v1263_v48 }
 0x41a   : > { %v3157_v49 = vadd.f32 %v1817_v4, %v1728_v41  ;;  %v1507_v52 = vmul.f32 %v1464_v55, %v1251_v22  ;;  %v1508_v58 = vmul.f32 %v1464_v55, %v1252_v39 }
 0x41b   : > { %v1145_v10 = vmul.f32 1.442695, %v1043_v42  ;;  %v1147_v34 = vmul.f32 1.442695, %v1044_v40  ;;  %1345 = vadd.xlane.f32.xlu0 %v1344_v5  ;;  %886 = vmax.xlane.f32.xlu1 %v885_v26 }
 0x41c   : > { %v2474_v9 = vpop.eup %2473  ;;  %v1334_v2 = vpop.xlane.xlu0 %1333  ;;  %v1559_v62 = vpack.c.bf16 %v1507_v52, %v1505_v54  ;;  %v1560_v28 = vpack.c.bf16 %v1508_v58, %v1506_v12 }
 0x41d   : > { %v2476_v51 = vpop.eup %2475  ;;  %v875_v45 = vpop.xlane.xlu1 %874  ;;  %2479 = vpow2.f32 %v1145_v10 }
 0x41e   : > { %v2478_v46 = vpop.eup %2477  ;;  %v949_v22 = vsub.f32 %v2865_v53, %v875_v45  ;;  %v950_v3 = vsub.f32 %v2867_v56, %v875_v45  ;;  %v3167_v59 = vpack.c.bf16 %v2476_v51, %v2474_v9  ;;  %2481 = vpow2.f32 %v1147_v34  ;;  %1742 = vmatmul.bf16.gmra.mxu0 %v1559_v62  ;;  %1831 = vmatmul.bf16.gmra.mxu1 %v1560_v28 }
 0x41f   : > { %2483 = vrcp.f32 %v1334_v2  ;;  %v1433_v55 = vpack.c.bf16 %v2478_v46, %v2478_v46  ;;  %v888_v53 = vmax.f32 %v2937_v18, %v2939_v23 }
 0x420   : > { %v993_v7 = vpack.c.bf16 %v950_v3, %v949_v22  ;;  %v1265_v39 = vunpack.c.l.bf16 %v3167_v59  ;;  %v1266_v43 = vunpack.c.h.bf16 %v3167_v59  ;;  %v891_v3 = vmax.f32 %v2949_v16, %v2951_v31 }
 0x421   : > { %v3171_v40 = vpop.f32.mrf.mxu0  ;;  %v3173_v41 = vpop.f32.mrf.mxu1  ;;  %v1465_v12 = vunpack.c.l.bf16 %v1433_v55 }
 0x422   : > { %v1045_v26 = vunpack.c.l.bf16 %v993_v7  ;;  %v1046_v42 = vunpack.c.h.bf16 %v993_v7  ;;  %v1347_v56 = vadd.f32 %v1266_v43, %v1265_v39 }
 0x423   : > { %v2480_v4 = vpop.eup %2479  ;;  %889 = vmax.xlane.f32.xlu0 %v888_v53  ;;  %v1509_v7 = vmul.f32 %v1465_v12, %v1253_v6 }
 0x424   : > { %v1149_v5 = vmul.f32 1.442695, %v1045_v26  ;;  %v1151_v54 = vmul.f32 1.442695, %v1046_v42  ;;  %1348 = vadd.xlane.f32.xlu1 %v1347_v56  ;;  %v2482_v52 = vpop.eup %2481  ;;  %v878_v58 = vpop.xlane.xlu0 %877 }
 0x425   : > { %v1337_v9 = vpop.xlane.xlu1 %1336  ;;  %v2484_v10 = vpop.eup %2483  ;;  %v951_v34 = vsub.f32 %v2881_v14, %v878_v58  ;;  %v952_v51 = vsub.f32 %v2883_v20, %v878_v58  ;;  %v3183_v2 = vpack.c.bf16 %v2482_v52, %v2480_v4  ;;  %v1510_v4 = vmul.f32 %v1465_v12, %v1254_v47 }
 0x426   : > { %2485 = vpow2.f32 %v1149_v5  ;;  %v1434_v62 = vpack.c.bf16 %v2484_v10, %v2484_v10 }
 0x427   : > { %2487 = vpow2.f32 %v1151_v54  ;;  %v994_v28 = vpack.c.bf16 %v952_v51, %v951_v34  ;;  %v1267_v45 = vunpack.c.l.bf16 %v3183_v2  ;;  %v1268_v46 = vunpack.c.h.bf16 %v3183_v2 }
 0x428   : > { %v1466_v22 = vunpack.c.l.bf16 %v1434_v62  ;;  %2489 = vrcp.f32 %v1337_v9 }
 0x429   : > { %v1047_v55 = vunpack.c.l.bf16 %v994_v28  ;;  %v1048_v14 = vunpack.c.h.bf16 %v994_v28  ;;  %v1733_v20 = vpop.f32.mrf.mxu0  ;;  %v1822_v26 = vpop.f32.mrf.mxu1  ;;  %v1350_v42 = vadd.f32 %v1268_v46, %v1267_v45 }
 0x42a   : > { %v3195_v53 = vadd.f32 %v1822_v26, %v1733_v20  ;;  %v1511_v56 = vmul.f32 %v1466_v22, %v1255_v35  ;;  %v1512_v6 = vmul.f32 %v1466_v22, %v1256_v25  ;;  %v3215_v26 = vpop.f32.mrf.mxu3 }
 0x42b   : > { %v1153_v54 = vmul.f32 1.442695, %v1047_v55  ;;  %v1155_v52 = vmul.f32 1.442695, %v1048_v14  ;;  %1351 = vadd.xlane.f32.xlu0 %v1350_v42 }
 0x42c   : > { %v2486_v5 = vpop.eup %2485  ;;  %892 = vmax.xlane.f32.xlu1 %v891_v3  ;;  %v1340_v9 = vpop.xlane.xlu0 %1339  ;;  %v1561_v10 = vpack.c.bf16 %v1511_v56, %v1509_v7  ;;  %v1562_v34 = vpack.c.bf16 %v1512_v6, %v1510_v4 }
 0x42d   : > { %v2488_v58 = vpop.eup %2487  ;;  %v881_v51 = vpop.xlane.xlu1 %880  ;;  %2491 = vpow2.f32 %v1153_v54 }
 0x42e   : > { %v953_v62 = vsub.f32 %v2897_v63, %v881_v51  ;;  %v954_v35 = vsub.f32 %v2899_v0, %v881_v51  ;;  %v3205_v19 = vpack.c.bf16 %v2488_v58, %v2486_v5  ;;  %2493 = vpow2.f32 %v1155_v52  ;;  %1747 = vmatmul.bf16.gmra.mxu0 %v1561_v10  ;;  %1836 = vmatmul.bf16.gmra.mxu1 %v1562_v34  ;;  %v2490_v47 = vpop.eup %2489  ;;  %v3213_v7 = vpop.f32.mrf.mxu2 }
 0x42f   : > { %2495 = vrcp.f32 %v1340_v9  ;;  %v1435_v0 = vpack.c.bf16 %v2490_v47, %v2490_v47 }
 0x430   : > { %v995_v13 = vpack.c.bf16 %v954_v35, %v953_v62  ;;  %v3607_v25 = vunpack.c.l.bf16 %v3205_v19  ;;  %v3605_v12 = vunpack.c.h.bf16 %v3205_v19 }
 0x431   : > { %v1467_v54 = vunpack.c.l.bf16 %v1435_v0 }
 0x432   : > { %v1049_v28 = vunpack.c.l.bf16 %v995_v13  ;;  %v1050_v22 = vunpack.c.h.bf16 %v995_v13  ;;  %v1353_v63 = vadd.f32 %v3605_v12, %v3607_v25 }
 0x433   : > { %v2492_v3 = vpop.eup %2491  ;;  %v1513_v35 = vmul.f32 %v1467_v54, %v1257_v27  ;;  %v1514_v13 = vmul.f32 %v1467_v54, %v1258_v1 }
 0x434   : > { %v1157_v55 = vmul.f32 1.442695, %v1049_v28  ;;  %v1159_v14 = vmul.f32 1.442695, %v1050_v22  ;;  %1354 = vadd.xlane.f32.xlu0 %v1353_v63  ;;  %v2494_v20 = vpop.eup %2493  ;;  %v884_v42 = vpop.xlane.xlu0 %883  ;;  %v3631_v28 = vunpack.c.h.bf16 %v3097_v24 }
 0x435   : > { %v2496_v56 = vpop.eup %2495  ;;  %v955_v4 = vsub.f32 %v2911_v44, %v884_v42  ;;  %v956_v6 = vsub.f32 %v2913_v57, %v884_v42  ;;  %v3219_v5 = vpack.c.bf16 %v2494_v20, %v2492_v3  ;;  %v900_v57 = vmax.f32 %v3213_v7, %v3215_v26  ;;  %v3239_v20 = vpop.f32.mrf.mxu3 }
 0x436   : > { %2497 = vpow2.f32 %v1157_v55  ;;  %v1436_v52 = vpack.c.bf16 %v2496_v56, %v2496_v56 }
 0x437   : > { %2499 = vpow2.f32 %v1159_v14  ;;  %v996_v58 = vpack.c.bf16 %v956_v6, %v955_v4  ;;  %v3606_v9 = vunpack.c.l.bf16 %v3219_v5  ;;  %v3604_v10 = vunpack.c.h.bf16 %v3219_v5  ;;  %v3237_v14 = vpop.f32.mrf.mxu2 }
 0x438   : > { %v1468_v34 = vunpack.c.l.bf16 %v1436_v52  ;;  %v903_v24 = vmax.f32 %v3237_v14, %v3239_v20 }
 0x439   : > { %v1051_v51 = vunpack.c.l.bf16 %v996_v58  ;;  %v1052_v62 = vunpack.c.h.bf16 %v996_v58  ;;  %v1356_v44 = vadd.f32 %v3604_v10, %v3606_v9 }
 0x43a   : > { %v1515_v47 = vmul.f32 %v1468_v34, %v1259_v50  ;;  %v1516_v22 = vmul.f32 %v1468_v34, %v3631_v28 }
 0x43b   : > { %v1161_v0 = vmul.f32 1.442695, %v1051_v51  ;;  %v1163_v3 = vmul.f32 1.442695, %v1052_v62  ;;  %1357 = vadd.xlane.f32.xlu1 %v1356_v44 }
 0x43c   : > { %v2498_v63 = vpop.eup %2497  ;;  %901 = vmax.xlane.f32.xlu0 %v900_v57  ;;  %v1563_v27 = vpack.c.bf16 %v1515_v47, %v1513_v35  ;;  %v1564_v42 = vpack.c.bf16 %v1516_v22, %v1514_v13  ;;  %v896_v57 = vpop.xlane.xlu2 %895  ;;  %v3632_v13 = vld [vmem:[#allocation2_spill] sm:$0xff]  ;;  %v3633_v22 = vld [vmem:[#allocation3_spill] sm:$0xff] }
 0x43d   : > { %v2500_v55 = vpop.eup %2499  ;;  %2501 = vpow2.f32 %v1161_v0  ;;  %v3255_v58 = vpop.f32.mrf.mxu3  ;;  %v963_v28 = vsub.f32 %v3632_v13, %v896_v57 }
 0x43e   : > { %v3241_v50 = vpack.c.bf16 %v2500_v55, %v2498_v63  ;;  %2503 = vpow2.f32 %v1163_v3  ;;  %1752 = vmatmul.bf16.gmra.mxu0 %v1563_v27  ;;  %1841 = vmatmul.bf16.gmra.mxu1 %v1564_v42  ;;  %v3265_v35 = vpop.f32.mrf.mxu0  ;;  %v3267_v47 = vpop.f32.mrf.mxu1  ;;  %v964_v63 = vsub.f32 %v3633_v22, %v896_v57 }
 0x43f   : > { %v3253_v52 = vpop.f32.mrf.mxu2 }
 0x440   : > { %v3603_v11 = vunpack.c.l.bf16 %v3241_v50  ;;  %v3602_v1 = vunpack.c.h.bf16 %v3241_v50  ;;  %v906_v44 = vmax.f32 %v3253_v52, %v3255_v58  ;;  %v1000_v27 = vpack.c.bf16 %v964_v63, %v963_v28 }
 0x442   : > { %v1359_v56 = vadd.f32 %v3602_v1, %v3603_v11  ;;  %v1060_v22 = vunpack.c.h.bf16 %v1000_v27 }
 0x443   : > { %v2502_v4 = vpop.eup %2501 }
 0x444   : > { %904 = vmax.xlane.f32.xlu0 %v903_v24  ;;  %1360 = vadd.xlane.f32.xlu1 %v1359_v56  ;;  %v2504_v6 = vpop.eup %2503  ;;  %v899_v42 = vpop.xlane.xlu2 %898  ;;  %v3634_v56 = vld [vmem:[#allocation4_spill] sm:$0xff] }
 0x445   : > { %v3251_v54 = vpack.c.bf16 %v2504_v6, %v2502_v4  ;;  %v965_v4 = vsub.f32 %v3634_v56, %v899_v42  ;;  %v3635_v6 = vld [vmem:[#allocation5_spill] sm:$0xff] }
 0x447   : > { %v3601_v34 = vunpack.c.l.bf16 %v3251_v54  ;;  %v3600_v51 = vunpack.c.h.bf16 %v3251_v54 }
 0x449   : > { %v1362_v62 = vadd.f32 %v3600_v51, %v3601_v34 }
 0x44b   : > { %1363 = vadd.xlane.f32.xlu2 %v1362_v62  ;;  %v966_v62 = vsub.f32 %v3635_v6, %v899_v42  ;;  %v1179_v6 = vmul.f32 1.442695, %v1060_v22 }
 0x44c   : > { %907 = vmax.xlane.f32.xlu1 %v906_v44  ;;  %v1059_v44 = vunpack.c.l.bf16 %v1000_v27 }
 0x486   : > { %v1343_v0 = vpop.xlane.xlu1 %1342 }
 0x487   : > { %2505 = vrcp.f32 %v1343_v0  ;;  %v1001_v0 = vpack.c.bf16 %v966_v62, %v965_v4 }
 0x489   : > { %v1738_v3 = vpop.f32.mrf.mxu0  ;;  %v1827_v55 = vpop.f32.mrf.mxu1  ;;  %v1061_v9 = vunpack.c.l.bf16 %v1001_v0 }
 0x48a   : > { %v3271_v24 = vadd.f32 %v1827_v55, %v1738_v3  ;;  %v1177_v3 = vmul.f32 1.442695, %v1059_v44 }
 0x48d   : > { %v2506_v1 = vpop.eup %2505 }
 0x48e   : > { %v1346_v51 = vpop.xlane.xlu0 %1345  ;;  %v887_v34 = vpop.xlane.xlu1 %886  ;;  %v1437_v55 = vpack.c.bf16 %v2506_v1, %v2506_v1 }
 0x48f   : > { %2507 = vrcp.f32 %v1346_v51  ;;  %v957_v13 = vsub.f32 %v2925_v15, %v887_v34  ;;  %v958_v57 = vsub.f32 %v2927_v29, %v887_v34  ;;  %v1062_v15 = vunpack.c.h.bf16 %v1001_v0 }
 0x490   : > { %2509 = vpow2.f32 %v1177_v3  ;;  %v1469_v34 = vunpack.c.l.bf16 %v1437_v55 }
 0x491   : > { %v997_v11 = vpack.c.bf16 %v958_v57, %v957_v13  ;;  %v1740_v28 = vpop.f32.mrf.mxu0  ;;  %v1829_v63 = vpop.f32.mrf.mxu1  ;;  %v1181_v13 = vmul.f32 1.442695, %v1061_v9  ;;  %v1183_v57 = vmul.f32 1.442695, %v1062_v15 }
 0x492   : > { %v3277_v10 = vadd.f32 %v1829_v63, %v1740_v28  ;;  %v1517_v0 = vmul.f32 %v1469_v34, %v1261_v60  ;;  %v1518_v63 = vmul.f32 %v1469_v34, %v1262_v61 }
 0x493   : > { %v1053_v56 = vunpack.c.l.bf16 %v997_v11  ;;  %v1054_v42 = vunpack.c.h.bf16 %v997_v11 }
 0x494   : > { %v1895_v12 = vpack.c.bf16 %v3277_v10, %v3271_v24  ;;  %v1815_v10 = vadd.f32 %v3137_v36, %v3135_v17  ;;  %v3443_v17 = vld [vmem:[%s3576_s7] sm:$0xff] }
 0x495   : > { %v2508_v51 = vpop.eup %2507  ;;  %v1165_v25 = vmul.f32 1.442695, %v1053_v56  ;;  %v1167_v29 = vmul.f32 1.442695, %v1054_v42 }
 0x496   : > { %v1438_v27 = vpack.c.bf16 %v2508_v51, %v2508_v51  ;;  %v890_v4 = vpop.xlane.xlu0 %889  ;;  %v2510_v55 = vpop.eup %2509 }
 0x497   : > { %v1349_v62 = vpop.xlane.xlu1 %1348  ;;  %2511 = vpow2.f32 %v1165_v25  ;;  %v959_v1 = vsub.f32 %v2937_v18, %v890_v4  ;;  %v960_v44 = vsub.f32 %v2939_v23, %v890_v4 }
 0x498   : > { %v1470_v11 = vunpack.c.l.bf16 %v1438_v27  ;;  %2513 = vpow2.f32 %v1167_v29 }
 0x499   : > { %2515 = vpow2.f32 %v1179_v6  ;;  %v998_v22 = vpack.c.bf16 %v960_v44, %v959_v1 }
 0x49a   : > { %v1519_v28 = vmul.f32 %v1470_v11, %v1263_v48  ;;  %v1520_v18 = vmul.f32 %v1470_v11, %v1264_v33  ;;  %2517 = vrcp.f32 %v1349_v62 }
 0x49b   : > { %v1055_v25 = vunpack.c.l.bf16 %v998_v22  ;;  %v1056_v23 = vunpack.c.h.bf16 %v998_v22  ;;  %v3291_v3 = vpop.f32.mrf.mxu0  ;;  %v3293_v9 = vpop.f32.mrf.mxu1  ;;  %2519 = vpow2.f32 %v1181_v13 }
 0x49c   : > { %v1565_v56 = vpack.c.bf16 %v1519_v28, %v1517_v0  ;;  %v1566_v42 = vpack.c.bf16 %v1520_v18, %v1518_v63  ;;  %2521 = vpow2.f32 %v1183_v57 }
 0x49d   : > { %v2512_v60 = vpop.eup %2511  ;;  %v1169_v6 = vmul.f32 1.442695, %v1055_v25  ;;  %v1171_v48 = vmul.f32 1.442695, %v1056_v23 }
 0x49e   : > { %v2514_v51 = vpop.eup %2513  ;;  %v1352_v8 = vpop.xlane.xlu0 %1351  ;;  %1757 = vmatmul.bf16.gmra.mxu0 %v1565_v56  ;;  %1846 = vmatmul.bf16.gmra.mxu1 %v1566_v42 }
 0x49f   : > { %v893_v61 = vpop.xlane.xlu1 %892  ;;  %v2516_v32 = vpop.eup %2515  ;;  %2523 = vpow2.f32 %v1169_v6  ;;  %v3297_v29 = vpack.c.bf16 %v2514_v51, %v2512_v60 }
 0x4a0   : > { %v961_v33 = vsub.f32 %v2949_v16, %v893_v61  ;;  %v962_v15 = vsub.f32 %v2951_v31, %v893_v61  ;;  %2525 = vpow2.f32 %v1171_v48  ;;  %v2518_v34 = vpop.eup %2517  ;;  %v3309_v31 = vpack.c.bf16 %v2516_v32, %v2510_v55 }
 0x4a1   : > { %2527 = vrcp.f32 %v1352_v8  ;;  %v1277_v4 = vunpack.c.l.bf16 %v3297_v29  ;;  %v1278_v62 = vunpack.c.h.bf16 %v3297_v29  ;;  %v2520_v1 = vpop.eup %2519  ;;  %v1439_v0 = vpack.c.bf16 %v2518_v34, %v2518_v34 }
 0x4a2   : > { %v999_v27 = vpack.c.bf16 %v962_v15, %v961_v33  ;;  %v2522_v22 = vpop.eup %2521  ;;  %v1283_v60 = vunpack.c.l.bf16 %v3309_v31  ;;  %v3610_v6 = vunpack.c.h.bf16 %v3309_v31 }
 0x4a3   : > { %v3301_v13 = vpop.f32.mrf.mxu0  ;;  %v3303_v57 = vpop.f32.mrf.mxu1  ;;  %v1365_v16 = vadd.f32 %v1278_v62, %v1277_v4  ;;  %v1471_v48 = vunpack.c.l.bf16 %v1439_v0  ;;  %v3317_v32 = vpack.c.bf16 %v2522_v22, %v2520_v1 }
 0x4a4   : > { %v1057_v44 = vunpack.c.l.bf16 %v999_v27  ;;  %v1058_v11 = vunpack.c.h.bf16 %v999_v27  ;;  %v1374_v27 = vadd.f32 %v3610_v6, %v1283_v60 }
 0x4a5   : > { %v2524_v28 = vpop.eup %2523  ;;  %1366 = vadd.xlane.f32.xlu2 %v1365_v16 }
 0x4a6   : > { %v1173_v63 = vmul.f32 1.442695, %v1057_v44  ;;  %v1175_v18 = vmul.f32 1.442695, %v1058_v11  ;;  %v2526_v25 = vpop.eup %2525  ;;  %v1521_v44 = vmul.f32 %v1471_v48, %v1265_v39  ;;  %v1522_v11 = vmul.f32 %v1471_v48, %v1266_v43 }
 0x4a7   : > { %v1355_v23 = vpop.xlane.xlu0 %1354  ;;  %v2528_v56 = vpop.eup %2527  ;;  %v3311_v42 = vpack.c.bf16 %v2526_v25, %v2524_v28  ;;  %v3608_v39 = vunpack.c.h.bf16 %v3317_v32 }
 0x4a8   : > { %2529 = vpow2.f32 %v1173_v63  ;;  %v1440_v51 = vpack.c.bf16 %v2528_v56, %v2528_v56 }
 0x4a9   : > { %2531 = vpow2.f32 %v1175_v18  ;;  %v1279_v55 = vunpack.c.l.bf16 %v3311_v42  ;;  %v1280_v8 = vunpack.c.h.bf16 %v3311_v42 }
 0x4aa   : > { %2533 = vrcp.f32 %v1355_v23  ;;  %v1472_v61 = vunpack.c.l.bf16 %v1440_v51  ;;  %v3609_v23 = vunpack.c.l.bf16 %v3317_v32 }
 0x4ab   : > { %v3319_v33 = vpop.f32.mrf.mxu0  ;;  %v3321_v15 = vpop.f32.mrf.mxu1  ;;  %v1368_v34 = vadd.f32 %v1280_v8, %v1279_v55 }
 0x4ac   : > { %v1523_v1 = vmul.f32 %v1472_v61, %v1267_v45  ;;  %v1524_v16 = vmul.f32 %v1472_v61, %v1268_v46 }
 0x4ad   : > { %1369 = vadd.xlane.f32.xlu0 %v1368_v34  ;;  %1375 = vadd.xlane.f32.xlu2 %v1374_v27 }
 0x4ae   : > { %v2530_v22 = vpop.eup %2529  ;;  %v1567_v63 = vpack.c.bf16 %v1523_v1, %v1521_v44  ;;  %v1568_v18 = vpack.c.bf16 %v1524_v16, %v1522_v11  ;;  %v1358_v25 = vpop.xlane.xlu1 %1357 }
 0x4af   : > { %v2532_v0 = vpop.eup %2531  ;;  %v902_v28 = vpop.xlane.xlu0 %901  ;;  %2535 = vrcp.f32 %v1358_v25 }
 0x4b0   : > { %v2534_v56 = vpop.eup %2533  ;;  %v967_v45 = vsub.f32 %v3213_v7, %v902_v28  ;;  %v968_v59 = vsub.f32 %v3215_v26, %v902_v28  ;;  %v3343_v43 = vpack.c.bf16 %v2532_v0, %v2530_v22  ;;  %1762 = vmatmul.bf16.gmra.mxu0 %v1567_v63  ;;  %1851 = vmatmul.bf16.gmra.mxu1 %v1568_v18 }
 0x4b1   : > { %v1441_v51 = vpack.c.bf16 %v2534_v56, %v2534_v56  ;;  %v1377_v26 = vadd.f32 %v3608_v39, %v3609_v23 }
 0x4b2   : > { %v1002_v2 = vpack.c.bf16 %v968_v59, %v967_v45  ;;  %v1281_v46 = vunpack.c.l.bf16 %v3343_v43  ;;  %v1282_v48 = vunpack.c.h.bf16 %v3343_v43  ;;  %v3636_v59 = vunpack.c.l.bf16 %v3205_v19 }
 0x4b3   : > { %v3347_v27 = vpop.f32.mrf.mxu0  ;;  %v1839_v44 = vpop.f32.mrf.mxu1  ;;  %v1473_v22 = vunpack.c.l.bf16 %v1441_v51 }
 0x4b4   : > { %v1063_v61 = vunpack.c.l.bf16 %v1002_v2  ;;  %v1064_v34 = vunpack.c.h.bf16 %v1002_v2  ;;  %v1371_v7 = vadd.f32 %v1282_v48, %v1281_v46 }
 0x4b5   : > { %v2536_v1 = vpop.eup %2535  ;;  %1378 = vadd.xlane.f32.xlu0 %v1377_v26  ;;  %v1525_v2 = vmul.f32 %v1473_v22, %v3636_v59  ;;  %v3639_v26 = vunpack.c.h.bf16 %v3219_v5 }
 0x4b6   : > { %v1185_v11 = vmul.f32 1.442695, %v1063_v61  ;;  %v1187_v16 = vmul.f32 1.442695, %v1064_v34  ;;  %1372 = vadd.xlane.f32.xlu1 %v1371_v7  ;;  %v1442_v0 = vpack.c.bf16 %v2536_v1, %v2536_v1  ;;  %v3637_v61 = vunpack.c.l.bf16 %v3219_v5 }
 0x4b7   : > { %v905_v28 = vpop.xlane.xlu0 %904  ;;  %v1361_v63 = vpop.xlane.xlu1 %1360  ;;  %v3638_v7 = vunpack.c.h.bf16 %v3205_v19 }
 0x4b8   : > { %2537 = vpow2.f32 %v1185_v11  ;;  %v969_v18 = vsub.f32 %v3237_v14, %v905_v28  ;;  %v970_v25 = vsub.f32 %v3239_v20, %v905_v28  ;;  %v1474_v56 = vunpack.c.l.bf16 %v1442_v0 }
 0x4b9   : > { %2539 = vpow2.f32 %v1187_v16  ;;  %v1526_v51 = vmul.f32 %v1473_v22, %v3638_v7 }
 0x4ba   : > { %v1003_v45 = vpack.c.bf16 %v970_v25, %v969_v18  ;;  %v1527_v34 = vmul.f32 %v1474_v56, %v3637_v61  ;;  %v1528_v1 = vmul.f32 %v1474_v56, %v3639_v26  ;;  %2541 = vrcp.f32 %v1361_v63 }
 0x4bb   : > { %v1753_v14 = vpop.f32.mrf.mxu0  ;;  %v1842_v20 = vpop.f32.mrf.mxu1 }
 0x4bc   : > { %v1065_v11 = vunpack.c.l.bf16 %v1003_v45  ;;  %v1066_v39 = vunpack.c.h.bf16 %v1003_v45  ;;  %v1569_v16 = vpack.c.bf16 %v1527_v34, %v1525_v2  ;;  %v1570_v0 = vpack.c.bf16 %v1528_v1, %v1526_v51 }
 0x4be   : > { %v2538_v28 = vpop.eup %2537  ;;  %v1189_v18 = vmul.f32 1.442695, %v1065_v11  ;;  %v1191_v25 = vmul.f32 1.442695, %v1066_v39  ;;  %v1364_v6 = vpop.xlane.xlu2 %1363 }
 0x4bf   : > { %v2540_v59 = vpop.eup %2539  ;;  %v908_v23 = vpop.xlane.xlu1 %907 }
 0x4c0   : > { %2543 = vpow2.f32 %v1189_v18  ;;  %v971_v19 = vsub.f32 %v3253_v52, %v908_v23  ;;  %v972_v22 = vsub.f32 %v3255_v58, %v908_v23  ;;  %v3369_v5 = vpack.c.bf16 %v2540_v59, %v2538_v28  ;;  %1767 = vmatmul.bf16.gmra.mxu0 %v1569_v16  ;;  %1856 = vmatmul.bf16.gmra.mxu1 %v1570_v0  ;;  %v2542_v63 = vpop.eup %2541 }
 0x4c1   : > { %2545 = vpow2.f32 %v1191_v25  ;;  %v1443_v58 = vpack.c.bf16 %v2542_v63, %v2542_v63  ;;  %v1843_v23 = vadd.f32 %v1842_v20, %v1753_v14  ;;  %v1840_v28 = vadd.f32 %v1839_v44, %v3347_v27 }
 0x4c2   : > { %v1004_v56 = vpack.c.bf16 %v972_v22, %v971_v19  ;;  %2547 = vrcp.f32 %v1364_v6  ;;  %v1287_v45 = vunpack.c.l.bf16 %v3369_v5  ;;  %v1288_v39 = vunpack.c.h.bf16 %v3369_v5 }
 0x4c3   : > { %v1755_v34 = vpop.f32.mrf.mxu0  ;;  %v1844_v7 = vpop.f32.mrf.mxu1  ;;  %v1475_v25 = vunpack.c.l.bf16 %v1443_v58  ;;  %v1838_v14 = vadd.f32 %v3321_v15, %v3319_v33  ;;  %v3640_v44 = vunpack.c.l.bf16 %v3241_v50  ;;  %v3642_v33 = vunpack.c.l.bf16 %v3251_v54 }
 0x4c4   : > { %v1067_v2 = vunpack.c.l.bf16 %v1004_v56  ;;  %v1068_v61 = vunpack.c.h.bf16 %v1004_v56  ;;  %v1380_v52 = vadd.f32 %v1288_v39, %v1287_v45  ;;  %v1845_v51 = vadd.f32 %v1844_v7, %v1755_v34 }
 0x4c5   : > { %v1897_v56 = vpack.c.bf16 %v1840_v28, %v1838_v14  ;;  %v3643_v7 = vunpack.c.h.bf16 %v3251_v54  ;;  %v1810_v14 = vadd.f32 %v3115_v21, %v3113_v37  ;;  %v3450_v37 = vld [vmem:[%s3576_s7 + $0x8] sm:$0xff] }
 0x4c6   : > { %v2544_v26 = vpop.eup %2543  ;;  %v1193_v1 = vmul.f32 1.442695, %v1067_v2  ;;  %v1195_v11 = vmul.f32 1.442695, %v1068_v61  ;;  %1381 = vadd.xlane.f32.xlu1 %v1380_v52  ;;  %v1898_v16 = vpack.c.bf16 %v1845_v51, %v1843_v23  ;;  %v1529_v2 = vmul.f32 %v1475_v25, %v3640_v44 }
 0x4c7   : > { %v2546_v6 = vpop.eup %2545  ;;  %v3641_v61 = vunpack.c.h.bf16 %v3241_v50  ;;  %v1966_v50 = vsel %vm513_vm1, %v1897_v56, 0 }
 0x4c8   : > { %v2548_v0 = vpop.eup %2547  ;;  %2549 = vpow2.f32 %v1193_v1  ;;  %v3378_v18 = vpack.c.bf16 %v2546_v6, %v2544_v26  ;;  %v1969_v19 = vsel %vm513_vm1, %v1898_v16, 0  ;;  %v1833_v16 = vadd.f32 %v3293_v9, %v3291_v3  ;;  %v1910_v9 = vld [vmem:[%s3577_s8 + $0x18] sm:$0xff] }
 0x4c9   : > { %2551 = vpow2.f32 %v1195_v11  ;;  %v1444_v59 = vpack.c.bf16 %v2548_v0, %v2548_v0  ;;  %1995 = vmatpush.bf16.xpose.msra.mxu2 %v1969_v19  ;;  %v1530_v34 = vmul.f32 %v1475_v25, %v3641_v61  ;;  %v1835_v11 = vadd.f32 %v3303_v57, %v3301_v13  ;;  %v1907_v57 = vld [vmem:[%s3577_s8] sm:$0xff]  ;;  %v1909_v19 = vld [vmem:[%s3577_s8 + $0x10] sm:$0xff] }
 0x4ca   : > { %v1289_v20 = vunpack.c.l.bf16 %v3378_v18  ;;  %v1290_v22 = vunpack.c.h.bf16 %v3378_v18  ;;  %v1825_v25 = vadd.f32 %v3267_v47, %v3265_v35  ;;  %v1960_v3 = vsel %vm513_vm1, %v1895_v12, 0 }
 0x4cb   : > { %v1476_v63 = vunpack.c.l.bf16 %v1444_v59  ;;  %v1896_v28 = vpack.c.bf16 %v1835_v11, %v1833_v16  ;;  %v1820_v35 = vadd.f32 %v3173_v41, %v3171_v40  ;;  %v1891_v40 = vpack.c.bf16 %v1810_v14, %v3109_v30 }
 0x4cc   : > { %v1383_v27 = vadd.f32 %v1290_v22, %v1289_v20  ;;  %v1894_v59 = vpack.c.bf16 %v1825_v25, %v3195_v53  ;;  %v1892_v53 = vpack.c.bf16 %v1815_v10, %v3127_v38 }
 0x4cd   : > { %v1531_v15 = vmul.f32 %v1476_v63, %v3642_v33  ;;  %v1532_v52 = vmul.f32 %v1476_v63, %v3643_v7  ;;  %v1963_v13 = vsel %vm513_vm1, %v1896_v28, 0  ;;  %v1893_v12 = vpack.c.bf16 %v1820_v35, %v3157_v49 }
 0x4ce   : > { %v2550_v58 = vpop.eup %2549  ;;  %1384 = vadd.xlane.f32.xlu2 %v1383_v27  ;;  %v1957_v47 = vsel %vm513_vm1, %v1894_v59, 0  ;;  %v1951_v63 = vsel %vm513_vm1, %v1892_v53, 0  ;;  %v1948_v41 = vsel %vm513_vm1, %v1891_v40, 0 }
 0x4cf   : > { %v2552_v23 = vpop.eup %2551  ;;  %v1571_v51 = vpack.c.bf16 %v1531_v15, %v1529_v2  ;;  %v1572_v26 = vpack.c.bf16 %v1532_v52, %v1530_v34  ;;  %v1954_v24 = vsel %vm513_vm1, %v1893_v12, 0 }
 0x4d0   : > { %v3397_v1 = vpack.c.bf16 %v2552_v23, %v2550_v58 }
 0x4d1   : > { %1772 = vmatmul.bf16.gmra.mxu0 %v1571_v51  ;;  %1861 = vmatmul.bf16.gmra.mxu1 %v1572_v26 }
 0x4d2   : > { %1996 = vmatpush.bf16.xpose.msra.mxu2 %v1966_v50  ;;  %v1291_v6 = vunpack.c.l.bf16 %v3397_v1  ;;  %v1292_v54 = vunpack.c.h.bf16 %v3397_v1 }
 0x4d4   : > { %v1386_v0 = vadd.f32 %v1292_v54, %v1291_v6 }
 0x4d6   : > { %1387 = vadd.xlane.f32.xlu0 %v1386_v0 }
 0x4da   : > { %1997 = vmatpush.bf16.xpose.msra.mxu2 %v1963_v13 }
 0x4df   : > { %1913 = vperm.xlu1 %2375, %v1907_v57  }
 0x4e2   : > { %1998 = vmatpush.bf16.xpose.msra.mxu2 %v1960_v3 }
 0x4e7   : > { %1928 = vperm.xlu1 %2375, %v1910_v9  }
 0x4ea   : > { %1999 = vmatpush.bf16.xpose.msra.mxu2 %v1957_v47  ;;  %1923 = vperm.xlu0 %2374, %v1909_v19  }
 0x4f2   : > { %2000 = vmatpush.bf16.xpose.msra.mxu2 %v1954_v24  ;;  %v3644_v24 = vunpack.c.h.bf16 %v3309_v31 }
 0x4fa   : > { %2001 = vmatpush.bf16.xpose.msra.mxu2 %v1951_v63 }
 0x502   : > { %2002 = vmatpush.bf16.xpose.msra.mxu2 %v1948_v41 }
 0x509   : > { %2313 = vmatmul.msk.bf16.vlgmr.msra.gmra.mxu2 %vm513_vm1, %v3443_v17 }
 0x518   : > { %v1367_v30 = vpop.xlane.xlu2 %1366 }
 0x519   : > { %2314 = vmatmul.msk.bf16.gmra.mxu2 %vm513_vm1, %v3450_v37  ;;  %2553 = vrcp.f32 %v1367_v30 }
 0x51b   : > { %v1758_v21 = vpop.f32.mrf.mxu0  ;;  %v1847_v38 = vpop.f32.mrf.mxu1 }
 0x51c   : > { %v3454_v36 = vadd.f32 %v1847_v38, %v1758_v21 }
 0x51f   : > { %v2554_v56 = vpop.eup %2553 }
 0x520   : > { %v1370_v49 = vpop.xlane.xlu0 %1369  ;;  %v1445_v2 = vpack.c.bf16 %v2554_v56, %v2554_v56  ;;  %v1376_v52 = vpop.xlane.xlu2 %1375 }
 0x521   : > { %2555 = vrcp.f32 %v1370_v49 }
 0x522   : > { %v1477_v15 = vunpack.c.l.bf16 %v1445_v2 }
 0x523   : > { %v1760_v27 = vpop.f32.mrf.mxu0  ;;  %v1849_v44 = vpop.f32.mrf.mxu1 }
 0x524   : > { %v3456_v61 = vadd.f32 %v1849_v44, %v1760_v27  ;;  %v1533_v51 = vmul.f32 %v1477_v15, %v1277_v4  ;;  %v1534_v26 = vmul.f32 %v1477_v15, %v1278_v62 }
 0x526   : > { %v1899_v34 = vpack.c.bf16 %v3456_v61, %v3454_v36 }
 0x527   : > { %v2556_v33 = vpop.eup %2555 }
 0x528   : > { %v1446_v7 = vpack.c.bf16 %v2556_v33, %v2556_v33  ;;  %v1379_v42 = vpop.xlane.xlu0 %1378 }
 0x529   : > { %v1373_v58 = vpop.xlane.xlu1 %1372 }
 0x52a   : > { %2557 = vrcp.f32 %v1373_v58  ;;  %v1478_v23 = vunpack.c.l.bf16 %v1446_v7  ;;  %v3645_v7 = vunpack.c.l.bf16 %v3317_v32  ;;  %v3646_v58 = vunpack.c.h.bf16 %v3317_v32 }
 0x52b   : > { %2559 = vrcp.f32 %v1376_v52 }
 0x52c   : > { %v1535_v11 = vmul.f32 %v1478_v23, %v1279_v55  ;;  %v1536_v50 = vmul.f32 %v1478_v23, %v1280_v8 }
 0x52d   : > { %v1763_v16 = vpop.f32.mrf.mxu0  ;;  %v1852_v0 = vpop.f32.mrf.mxu1 }
 0x52e   : > { %v3468_v28 = vadd.f32 %v1852_v0, %v1763_v16  ;;  %v1573_v13 = vpack.c.bf16 %v1535_v11, %v1533_v51  ;;  %v1574_v57 = vpack.c.bf16 %v1536_v50, %v1534_v26 }
 0x530   : > { %v2558_v25 = vpop.eup %2557  ;;  %1777 = vmatmul.bf16.gmra.mxu0 %v1573_v13  ;;  %1866 = vmatmul.bf16.gmra.mxu1 %v1574_v57 }
 0x531   : > { %v2560_v3 = vpop.eup %2559  ;;  %v1447_v4 = vpack.c.bf16 %v2558_v25, %v2558_v25 }
 0x532   : > { %v1448_v9 = vpack.c.bf16 %v2560_v3, %v2560_v3 }
 0x533   : > { %v1479_v59 = vunpack.c.l.bf16 %v1447_v4 }
 0x534   : > { %v1480_v55 = vunpack.c.l.bf16 %v1448_v9 }
 0x535   : > { %v1765_v29 = vpop.f32.mrf.mxu0  ;;  %v1854_v62 = vpop.f32.mrf.mxu1  ;;  %v1537_v47 = vmul.f32 %v1479_v59, %v1281_v46  ;;  %v1538_v12 = vmul.f32 %v1479_v59, %v1282_v48 }
 0x536   : > { %v3470_v19 = vadd.f32 %v1854_v62, %v1765_v29  ;;  %v1539_v10 = vmul.f32 %v1480_v55, %v1283_v60  ;;  %v1540_v53 = vmul.f32 %v1480_v55, %v3644_v24 }
 0x538   : > { %v1900_v8 = vpack.c.bf16 %v3470_v19, %v3468_v28  ;;  %v1575_v41 = vpack.c.bf16 %v1539_v10, %v1537_v47  ;;  %v1576_v30 = vpack.c.bf16 %v1540_v53, %v1538_v12 }
 0x539   : > { %v1382_v35 = vpop.xlane.xlu1 %1381 }
 0x53a   : > { %2561 = vrcp.f32 %v1382_v35 }
 0x53b   : > { %2563 = vrcp.f32 %v1379_v42 }
 0x53d   : > { %v1768_v14 = vpop.f32.mrf.mxu0  ;;  %v1857_v63 = vpop.f32.mrf.mxu1 }
 0x53e   : > { %v3482_v40 = vadd.f32 %v1857_v63, %v1768_v14 }
 0x540   : > { %v2562_v21 = vpop.eup %2561  ;;  %1782 = vmatmul.bf16.gmra.mxu0 %v1575_v41  ;;  %1871 = vmatmul.bf16.gmra.mxu1 %v1576_v30 }
 0x541   : > { %v2564_v46 = vpop.eup %2563  ;;  %v1450_v38 = vpack.c.bf16 %v2562_v21, %v2562_v21  ;;  %v1385_v31 = vpop.xlane.xlu2 %1384 }
 0x542   : > { %v1449_v43 = vpack.c.bf16 %v2564_v46, %v2564_v46 }
 0x543   : > { %v1482_v56 = vunpack.c.l.bf16 %v1450_v38 }
 0x544   : > { %v1481_v60 = vunpack.c.l.bf16 %v1449_v43 }
 0x545   : > { %v1770_v48 = vpop.f32.mrf.mxu0  ;;  %v1859_v49 = vpop.f32.mrf.mxu1  ;;  %v1543_v33 = vmul.f32 %v1482_v56, %v1287_v45  ;;  %v1544_v15 = vmul.f32 %v1482_v56, %v1288_v39 }
 0x546   : > { %v3484_v27 = vadd.f32 %v1859_v49, %v1770_v48  ;;  %v1541_v52 = vmul.f32 %v1481_v60, %v3645_v7  ;;  %v1542_v23 = vmul.f32 %v1481_v60, %v3646_v58 }
 0x548   : > { %v1901_v44 = vpack.c.bf16 %v3484_v27, %v3482_v40  ;;  %v1577_v50 = vpack.c.bf16 %v1543_v33, %v1541_v52  ;;  %v1578_v16 = vpack.c.bf16 %v1544_v15, %v1542_v23  ;;  %v1908_v40 = vld [vmem:[%s3577_s8 + $0x8] sm:$0xff] }
 0x549   : > { %v1388_v2 = vpop.xlane.xlu0 %1387  ;;  %1918 = vperm.xlu2 %2376, %v1908_v40  }
 0x54a   : > { %2565 = vrcp.f32 %v1388_v2 }
 0x54b   : > { %2567 = vrcp.f32 %v1385_v31 }
 0x54e   : > { %v1773_v51 = vpop.f32.mrf.mxu0  ;;  %v1862_v26 = vpop.f32.mrf.mxu1 }
 0x54f   : > { %v3496_v11 = vadd.f32 %v1862_v26, %v1773_v51 }
 0x550   : > { %v2566_v0 = vpop.eup %2565  ;;  %1787 = vmatmul.bf16.gmra.mxu0 %v1577_v50  ;;  %1876 = vmatmul.bf16.gmra.mxu1 %v1578_v16 }
 0x551   : > { %v2568_v45 = vpop.eup %2567  ;;  %v1452_v5 = vpack.c.bf16 %v2566_v0, %v2566_v0  ;;  %v3507_v62 = vpop.permute.xlu1 %1913 }
 0x552   : > { %v1451_v39 = vpack.c.bf16 %v2568_v45, %v2568_v45 }
 0x553   : > { %v1484_v13 = vunpack.c.l.bf16 %v1452_v5 }
 0x554   : > { %v1483_v57 = vunpack.c.l.bf16 %v1451_v39 }
 0x555   : > { %v1547_v25 = vmul.f32 %v1484_v13, %v1291_v6  ;;  %v1548_v32 = vmul.f32 %v1484_v13, %v1292_v54 }
 0x556   : > { %v1545_v3 = vmul.f32 %v1483_v57, %v1289_v20  ;;  %v1546_v4 = vmul.f32 %v1483_v57, %v1290_v22  ;;  %v1775_v12 = vpop.f32.mrf.mxu0  ;;  %v1864_v10 = vpop.f32.mrf.mxu1 }
 0x558   : > { %v1579_v9 = vpack.c.bf16 %v1547_v25, %v1545_v3  ;;  %v1580_v29 = vpack.c.bf16 %v1548_v32, %v1546_v4  ;;  %v1865_v25 = vadd.f32 %v1864_v10, %v1775_v12 }
 0x559   : > { %v3522_v42 = vpop.permute.xlu1 %1928 }
 0x55a   : > { %v1902_v3 = vpack.c.bf16 %v1865_v25, %v3496_v11  ;;  %v1972_v11 = vsel %vm513_vm1, %v1899_v34, 0 }
 0x55c   : > { %v3518_v22 = vpop.permute.xlu0 %1923  ;;  %v1981_v4 = vsel %vm513_vm1, %v1902_v3, 0 }
 0x560   : > { %1792 = vmatmul.bf16.gmra.mxu0 %v1579_v9  ;;  %1881 = vmatmul.bf16.gmra.mxu1 %v1580_v29  ;;  %v1978_v9 = vsel %vm513_vm1, %v1901_v44, 0  ;;  %v1975_v29 = vsel %vm513_vm1, %v1900_v8, 0 }
 0x58c   : > { %v2004_v59 = vpop.f32.mrf.mxu2 }
 0x58d   : > { %v2005_v55 = vadd.f32 %v2004_v59, %v3507_v62 }
 0x58f   : > { %v2033_v18 = vmax.f32 %v2005_v55, 0.0 }
 0x591   : > { %2041 = vst [vmem:[%s3513_s16] sm:$0xff] %v2033_v18 }
 0x594   : > { %v3516_v20 = vpop.f32.mrf.mxu2 }
 0x59c   : > { %v2009_v1 = vpop.f32.mrf.mxu2 }
 0x59d   : > { %v2010_v6 = vadd.f32 %v2009_v1, %v3518_v22 }
 0x59f   : > { %v2037_v54 = vmax.f32 %v2010_v6, 0.0 }
 0x5a1   : > { %2045 = vst [vmem:[%s3513_s16 + $0x20] sm:$0xff] %v2037_v54 }
 0x5a3   : > { %v1919_v28 = vpop.permute.xlu2 %1918 }
 0x5a4   : > { %v2011_v35 = vpop.f32.mrf.mxu2  ;;  %v2007_v19 = vadd.f32 %v3516_v20, %v1919_v28 }
 0x5a5   : > { %v2012_v47 = vadd.f32 %v2011_v35, %v3522_v42 }
 0x5a6   : > { %v2035_v36 = vmax.f32 %v2007_v19, 0.0 }
 0x5a7   : > { %v2039_v24 = vmax.f32 %v2012_v47, 0.0 }
 0x5a8   : > { %2043 = vst [vmem:[%s3513_s16 + $0x10] sm:$0xff] %v2035_v36 }
 0x5a9   : > { %2047 = vst [vmem:[%s3513_s16 + $0x30] sm:$0xff] %v2039_v24 }
 0x5ad   : > { %v1778_v53 = vpop.f32.mrf.mxu0  ;;  %v1867_v14 = vpop.f32.mrf.mxu1 }
 0x5ae   : > { %v1868_v63 = vadd.f32 %v1867_v14, %v1778_v53 }
 0x5b5   : > { %v1780_v41 = vpop.f32.mrf.mxu0  ;;  %v1869_v30 = vpop.f32.mrf.mxu1 }
 0x5b6   : > { %v1870_v21 = vadd.f32 %v1869_v30, %v1780_v41 }
 0x5b8   : > { %v1903_v46 = vpack.c.bf16 %v1870_v21, %v1868_v63 }
 0x5ba   : > { %v1984_v32 = vsel %vm513_vm1, %v1903_v46, 0 }
 0x5bd   : > { %v1783_v38 = vpop.f32.mrf.mxu0  ;;  %v1872_v43 = vpop.f32.mrf.mxu1 }
 0x5be   : > { %v1873_v39 = vadd.f32 %v1872_v43, %v1783_v38 }
 0x5c5   : > { %v1785_v48 = vpop.f32.mrf.mxu0  ;;  %v1874_v49 = vpop.f32.mrf.mxu1 }
 0x5c6   : > { %v1875_v45 = vadd.f32 %v1874_v49, %v1785_v48 }
 0x5c8   : > { %v1904_v13 = vpack.c.bf16 %v1875_v45, %v1873_v39 }
 0x5ca   : > { %v1987_v57 = vsel %vm513_vm1, %v1904_v13, 0 }
 0x5cd   : > { %v1788_v56 = vpop.f32.mrf.mxu0  ;;  %v1877_v60 = vpop.f32.mrf.mxu1 }
 0x5ce   : > { %v1878_v16 = vadd.f32 %v1877_v60, %v1788_v56 }
 0x5d5   : > { %v1790_v31 = vpop.f32.mrf.mxu0  ;;  %v1879_v2 = vpop.f32.mrf.mxu1 }
 0x5d6   : > { %v1880_v26 = vadd.f32 %v1879_v2, %v1790_v31 }
 0x5d8   : > { %v1905_v0 = vpack.c.bf16 %v1880_v26, %v1878_v16 }
 0x5da   : > { %v1990_v5 = vsel %vm513_vm1, %v1905_v0, 0 }
 0x5dd   : > { %v1793_v33 = vpop.f32.mrf.mxu0  ;;  %v1882_v15 = vpop.f32.mrf.mxu1 }
 0x5de   : > { %v1883_v58 = vadd.f32 %v1882_v15, %v1793_v33 }
 0x5e5   : > { %v1795_v7 = vpop.f32.mrf.mxu0  ;;  %v1884_v52 = vpop.f32.mrf.mxu1 }
 0x5e6   : > { %v1885_v23 = vadd.f32 %v1884_v52, %v1795_v7 }
 0x5e8   : > { %v1906_v51 = vpack.c.bf16 %v1885_v23, %v1883_v58 }
 0x5ea   : > { %v1993_v50 = vsel %vm513_vm1, %v1906_v51, 0 }
 0x5eb   : > { %2014 = vmatpush.bf16.xpose.msra.mxu3 %v1993_v50 }
 0x5f3   : > { %2015 = vmatpush.bf16.xpose.msra.mxu3 %v1990_v5 }
 0x5fb   : > { %2016 = vmatpush.bf16.xpose.msra.mxu3 %v1987_v57 }
 0x603   : > { %2017 = vmatpush.bf16.xpose.msra.mxu3 %v1984_v32 }
 0x60b   : > { %2018 = vmatpush.bf16.xpose.msra.mxu3 %v1981_v4 }
 0x613   : > { %2019 = vmatpush.bf16.xpose.msra.mxu3 %v1978_v9 }
 0x61b   : > { %2020 = vmatpush.bf16.xpose.msra.mxu3 %v1975_v29 }
 0x623   : > { %2021 = vmatpush.bf16.xpose.msra.mxu3 %v1972_v11 }
 0x62a   : > { %2315 = vmatmul.msk.bf16.vlgmr.msra.gmra.mxu3 %vm513_vm1, %v3443_v17 }
 0x63a   : > { %2316 = vmatmul.msk.bf16.gmra.mxu3 %vm513_vm1, %v3450_v37 }
 0x6ad   : > { %v2023_v61 = vpop.f32.mrf.mxu3 }
 0x6ae   : > { %v2024_v34 = vadd.f32 %v2023_v61, %v3507_v62 }
 0x6b0   : > { %v2034_v8 = vmax.f32 %v2024_v34, 0.0 }
 0x6b2   : > { %2042 = vst [vmem:[%s3513_s16 + $0x8] sm:$0xff] %v2034_v8 }
 0x6b5   : > { %v2025_v17 = vpop.f32.mrf.mxu3 }
 0x6b6   : > { %v2026_v27 = vadd.f32 %v2025_v17, %v1919_v28 }
 0x6b8   : > { %v2036_v44 = vmax.f32 %v2026_v27, 0.0 }
 0x6ba   : > { %2044 = vst [vmem:[%s3513_s16 + $0x18] sm:$0xff] %v2036_v44 }
 0x6bd   : > { %v2028_v59 = vpop.f32.mrf.mxu3 }
 0x6be   : > { %v2029_v55 = vadd.f32 %v2028_v59, %v3518_v22 }
 0x6c0   : > { %v2038_v37 = vmax.f32 %v2029_v55, 0.0 }
 0x6c2   : > { %2046 = vst [vmem:[%s3513_s16 + $0x28] sm:$0xff] %v2038_v37 }
 0x6c5   : > { %v2030_v18 = vpop.f32.mrf.mxu3 }
 0x6c6   : > { %v2031_v20 = vadd.f32 %v2030_v18, %v3522_v42 }
 0x6c8   : > { %v2040_v1 = vmax.f32 %v2031_v20, 0.0 }
 0x6ca   : > { %2048 = vst [vmem:[%s3513_s16 + $0x38] sm:$0xff] %v2040_v1 }
 0x6cb PF: > { %s19_s11 = sadd.s32 1, %s2591_s11   ;;  %s3647_s30 = smov %s2587_s10 }
 0x6cc   : > { %p16_p5 = scmp.ge.s32.totalorder %s19_s11, 4   ;;  %s3648_s10 = smov %s3650_s12 }
 0x6ce   :  { %18 = sbr.rel (!%p16_p5) target bundleno = 2 (0x2), region = 92 }

</bundles_post_ra>
